<compile_context>
chip_gen: v5e
topology: v5e:2x2
jax: 0.10.0
libtpu: 0.0.40
codegen_flags: <defaults>
</compile_context>

<pallas_src>
import functools
import math

import jax
import jax.numpy as jnp
from jax.experimental import pallas as pl
from jax.experimental.pallas import tpu as pltpu


CFG = dict(vocab=100, hidden=32, heads=2, intermediate=64, layers=2,
           max_pos=16, type_vocab=2, num_labels=1)
LN_EPS = 1e-12


# ---------------------------------------------------------------------------
# In-kernel helpers
# ---------------------------------------------------------------------------

def _ln(x, gamma, beta, eps):
    """LayerNorm over last dim. x:(R,H) f32, gamma/beta:(1,H)."""
    mean = jnp.mean(x, axis=-1, keepdims=True)
    xc = x - mean
    var = jnp.mean(xc * xc, axis=-1, keepdims=True)
    inv = jax.lax.rsqrt(var + eps)
    return (xc * inv) * gamma + beta


def _mm(a, b):
    """bf16 MXU matmul with f32 accumulation."""
    return jnp.dot(a.astype(jnp.bfloat16), b.astype(jnp.bfloat16),
                   preferred_element_type=jnp.float32)


def _zero_index(ndim, i):
    return (0,) * ndim


# ---------------------------------------------------------------------------
# Single fused kernel: embeddings LN + L encoder layers + pooler + cls + MSE
# ---------------------------------------------------------------------------

def _bert_kernel(emb_ref, emb_g_ref, emb_b_ref,
                 wqkv_ref, bqkv_ref, wo_ref, bo_ref, ln1g_ref, ln1b_ref,
                 wi_ref, bi_ref, wf_ref, bf_ref, ln2g_ref, ln2b_ref,
                 pw_ref, pb_ref, cw_ref, cb_ref, lbl_ref,
                 logits_ref, loss_ref,
                 *, batch, seq, layers, num_heads, head_dim, eps):
    H = num_heads * head_dim

    # --- embeddings LayerNorm (no zero-residual, folded into this kernel) ---
    x = _ln(emb_ref[...], emb_g_ref[...], emb_b_ref[...], eps)   # (B*S, H) f32

    for l in range(layers):                                      # static unroll
        # ---- fused QKV projection: one (B*S, H) @ (H, 3H) MXU matmul ----
        qkv = _mm(x, wqkv_ref[l]) + bqkv_ref[l]                  # (B*S, 3H) f32
        # Single whole-tile f32 -> bf16 cast (not per head slice).
        qkv_bf = qkv.reshape(batch, seq, 3 * H).astype(jnp.bfloat16)

        # ---- per-head attention, contexts kept in vregs, one lane concat ----
        # TODO(synk): all-ones attention mask assumed; real BERT applies the
        # padding attention_mask to the scores here.
        ctx_heads = []
        for hh in range(num_heads):                              # static unroll
            lo = hh * head_dim
            qh = qkv_bf[:, :, lo:lo + head_dim]          # 1/sqrt(Dh) pre-folded
            kh = qkv_bf[:, :, H + lo:H + lo + head_dim]
            vh = qkv_bf[:, :, 2 * H + lo:2 * H + lo + head_dim]
            # q @ k^T per batch via transposed-contraction dot_general.
            s = jax.lax.dot_general(qh, kh, (((2,), (2,)), ((0,), (0,))),
                                    preferred_element_type=jnp.float32)  # (B,S,S)
            s = s - jnp.max(s, axis=-1, keepdims=True)
            p = jnp.exp(s)
            p = p * pl.reciprocal(jnp.sum(p, axis=-1, keepdims=True), approx=True)
            ctx_heads.append(jax.lax.dot_general(
                p.astype(jnp.bfloat16), vh, (((2,), (1,)), ((0,), (0,))),
                preferred_element_type=jnp.float32))                     # (B,S,Dh)
        ctx = jnp.concatenate(ctx_heads, axis=-1).reshape(batch * seq, H)

        # ---- attention output projection + residual + LN1 ----
        attn = _mm(ctx, wo_ref[l]) + bo_ref[l]
        x = _ln(attn + x, ln1g_ref[l], ln1b_ref[l], eps)

        # ---- FFN + residual + LN2 ----
        # TODO(synk): HF BERT uses exact erf-GELU; tanh approximation used for
        # Mosaic-safe EUP lowering.
        inter = jax.nn.gelu(_mm(x, wi_ref[l]) + bi_ref[l], approximate=True)
        ffn = _mm(inter, wf_ref[l]) + bf_ref[l]
        x = _ln(ffn + x, ln2g_ref[l], ln2b_ref[l], eps)

    # ---- pooler([CLS], tanh) + classifier (VPU matvec) + MSE loss ----
    cls = x.reshape(batch, seq, H)[:, 0:1, :].reshape(batch, H)  # (B, H)
    pooled = jnp.tanh(_mm(cls, pw_ref[...]) + pb_ref[...])       # (B, H)
    # num_labels == 1: broadcast-multiply + lane reduction instead of an
    # MXU matvec with a 1-lane output.
    logits = jnp.sum(pooled * cw_ref[...], axis=-1, keepdims=True) + cb_ref[...]
    logits_ref[...] = logits                                     # (B, 1)
    d = logits - lbl_ref[...]
    loss_ref[0, 0] = jnp.sum(d * d) / d.size                     # mean MSE


def bert_fused_forward(emb_flat, enc, head, labels2, *, batch, seq, cfg):
    """Runs the whole BERT forward in one pallas_call. Returns (loss, logits)."""
    H, I = cfg["hidden"], cfg["intermediate"]
    L, nH, N = cfg["layers"], cfg["heads"], cfg["num_labels"]
    Dh = H // nH
    BS = batch * seq

    args = (emb_flat, enc["emb_ln_g"], enc["emb_ln_b"],
            enc["w_qkv"], enc["b_qkv"], enc["wo"], enc["bo"],
            enc["ln1_g"], enc["ln1_b"],
            enc["wi"], enc["bi"], enc["wf"], enc["bf"],
            enc["ln2_g"], enc["ln2_b"],
            head["pool_w"], head["pool_b"], head["cls_w"], head["cls_b"],
            labels2)

    # Full-array blocks, single grid step (block shape == array shape satisfies
    # the (8,128) constraint escape hatch).
    in_specs = [pl.BlockSpec(tuple(a.shape), functools.partial(_zero_index, a.ndim))
                for a in args]

    flops = (L * (2 * BS * H * 3 * H            # qkv proj
                  + 4 * batch * seq * seq * H   # scores + context
                  + 2 * BS * H * H              # out proj
                  + 4 * BS * H * I)             # ffn
             + 2 * batch * H * H + 2 * batch * H)
    transcendentals = L * (batch * nH * seq * seq + BS * I) + batch * H
    bytes_accessed = 4 * (sum(int(a.size) for a in args) + batch * N + 1)

    kernel = functools.partial(_bert_kernel, batch=batch, seq=seq, layers=L,
                               num_heads=nH, head_dim=Dh, eps=LN_EPS)
    logits, loss = pl.pallas_call(
        kernel,
        out_shape=(jax.ShapeDtypeStruct((batch, N), jnp.float32),
                   jax.ShapeDtypeStruct((1, 1), jnp.float32)),
        grid=(1,),
        in_specs=in_specs,
        out_specs=(pl.BlockSpec((batch, N), lambda i: (0, 0)),
                   pl.BlockSpec(memory_space=pltpu.MemorySpace.SMEM)),
        compiler_params=pltpu.CompilerParams(dimension_semantics=("arbitrary",)),
        cost_estimate=pl.CostEstimate(flops=flops,
                                      transcendentals=transcendentals,
                                      bytes_accessed=bytes_accessed),
    )(*args)
    return loss[0, 0], logits


# ---------------------------------------------------------------------------
# Parameters (deterministic synthetic init, BERT-style N(0, 0.02))
# ---------------------------------------------------------------------------

def init_bert_params(key, cfg=CFG):
    # TODO(synk): from_pretrained weight loading is replaced by synthetic init.
    assert cfg["num_labels"] == 1
    H, I, L, nH = cfg["hidden"], cfg["intermediate"], cfg["layers"], cfg["heads"]
    Dh = H // nH
    scale = 1.0 / math.sqrt(Dh)

    def nrm(k, shape):
        return 0.02 * jax.random.normal(k, shape, jnp.float32)

    keys = iter(jax.random.split(key, 5 + 6 * L))
    word_emb = nrm(next(keys), (cfg["vocab"], H))
    pos_emb = nrm(next(keys), (cfg["max_pos"], H))
    type_emb = nrm(next(keys), (cfg["type_vocab"], H))
    pool_w = nrm(next(keys), (H, H))
    cls_w_row = nrm(next(keys), (1, H))       # (num_labels=1, H) classifier row

    w_qkv, wo, wi, wf = [], [], [], []
    for _ in range(L):
        wq = nrm(next(keys), (H, H)) * scale  # fold 1/sqrt(Dh) into Q columns
        wk = nrm(next(keys), (H, H))
        wv = nrm(next(keys), (H, H))
        w_qkv.append(jnp.concatenate([wq, wk, wv], axis=1))   # fused (H, 3H)
        wo.append(nrm(next(keys), (H, H)))
        wi.append(nrm(next(keys), (H, I)))
        wf.append(nrm(next(keys), (I, H)))

    enc = {
        "emb_ln_g": jnp.ones((1, H), jnp.float32),
        "emb_ln_b": jnp.zeros((1, H), jnp.float32),
        "w_qkv": jnp.stack(w_qkv),                        # (L, H, 3H), Q pre-scaled
        "b_qkv": jnp.zeros((L, 1, 3 * H), jnp.float32),   # (Q bias pre-scaled too)
        "wo": jnp.stack(wo), "bo": jnp.zeros((L, 1, H), jnp.float32),
        "ln1_g": jnp.ones((L, 1, H), jnp.float32),
        "ln1_b": jnp.zeros((L, 1, H), jnp.float32),
        "wi": jnp.stack(wi), "bi": jnp.zeros((L, 1, I), jnp.float32),
        "wf": jnp.stack(wf), "bf": jnp.zeros((L, 1, H), jnp.float32),
        "ln2_g": jnp.ones((L, 1, H), jnp.float32),
        "ln2_b": jnp.zeros((L, 1, H), jnp.float32),
    }
    head = {
        "pool_w": pool_w,
        "pool_b": jnp.zeros((1, H), jnp.float32),
        "cls_w": cls_w_row,                               # row vector for VPU matvec
        "cls_b": jnp.zeros((1, 1), jnp.float32),
    }
    return {"word_emb": word_emb, "pos_emb": pos_emb, "type_emb": type_emb,
            "enc": enc, "head": head}


# ---------------------------------------------------------------------------
# BERT.forward equivalent (num_labels == 1  ->  MSE regression loss)
# ---------------------------------------------------------------------------

def bert_forward(params, text, labels, cfg=CFG):
    """Returns (loss, logits), matching BERT.forward with num_labels=1."""
    B, S = text.shape
    H, N = cfg["hidden"], cfg["num_labels"]

    # Embedding gathers + adds are XLA glue; everything downstream is one kernel.
    we = jnp.take(params["word_emb"], text, axis=0)             # (B, S, H)
    pe = params["pos_emb"][:S][None, :, :]                      # (1, S, H)
    te = params["type_emb"][0][None, None, :]                   # token_type_ids = 0
    emb = (we + pe + te).astype(jnp.float32).reshape(B * S, H)  # (B*S, H)
    labels2 = labels.reshape(B, N).astype(jnp.float32)

    return bert_fused_forward(emb, params["enc"], params["head"], labels2,
                              batch=B, seq=S, cfg=cfg)


# ---------------------------------------------------------------------------

if __name__ == "__main__":
    key = jax.random.PRNGKey(0)
    k_params, k_text, k_labels = jax.random.split(key, 3)

    params = init_bert_params(k_params)

    B, S = 2, 8
    text = jax.random.randint(k_text, (B, S), 0, CFG["vocab"], dtype=jnp.int32)
    labels = jax.random.normal(k_labels, (B,), jnp.float32)

    loss, logits = jax.jit(bert_forward)(params, text, labels)
    jax.block_until_ready((loss, logits))

    assert logits.shape == (B, CFG["num_labels"])
    assert loss.shape == ()
    assert bool(jnp.isfinite(loss))
    print("KERNEL_OK")
</pallas_src>

<mosaic_0001>
module attributes {stable_mosaic.version = 11 : i64} {
  func.func @_bert_kernel(%arg0: i32, %arg1: memref<16x32xf32, #tpu.memory_space<vmem>>, %arg2: memref<1x32xf32, #tpu.memory_space<vmem>>, %arg3: memref<1x32xf32, #tpu.memory_space<vmem>>, %arg4: memref<2x32x96xf32, #tpu.memory_space<vmem>>, %arg5: memref<2x1x96xf32, #tpu.memory_space<vmem>>, %arg6: memref<2x32x32xf32, #tpu.memory_space<vmem>>, %arg7: memref<2x1x32xf32, #tpu.memory_space<vmem>>, %arg8: memref<2x1x32xf32, #tpu.memory_space<vmem>>, %arg9: memref<2x1x32xf32, #tpu.memory_space<vmem>>, %arg10: memref<2x32x64xf32, #tpu.memory_space<vmem>>, %arg11: memref<2x1x64xf32, #tpu.memory_space<vmem>>, %arg12: memref<2x64x32xf32, #tpu.memory_space<vmem>>, %arg13: memref<2x1x32xf32, #tpu.memory_space<vmem>>, %arg14: memref<2x1x32xf32, #tpu.memory_space<vmem>>, %arg15: memref<2x1x32xf32, #tpu.memory_space<vmem>>, %arg16: memref<32x32xf32, #tpu.memory_space<vmem>>, %arg17: memref<1x32xf32, #tpu.memory_space<vmem>>, %arg18: memref<1x32xf32, #tpu.memory_space<vmem>>, %arg19: memref<1x1xf32, #tpu.memory_space<vmem>>, %arg20: memref<2x1xf32, #tpu.memory_space<vmem>>, %arg21: memref<2x1xf32, #tpu.memory_space<vmem>>, %arg22: memref<1x1xf32, #tpu.memory_space<smem>>) attributes {dimension_semantics = [#tpu.dimension_semantics<arbitrary>], iteration_bounds = array<i64: 1>, scalar_prefetch = 0 : i64, scratch_operands = 0 : i64, tpu.core_type = #tpu.core_type<tc>, window_params = [{pipeline_mode = #tpu.pipeline_mode<synchronous>, transform_indices = @transform_0, window_bounds = array<i64: 16, 32>}, {pipeline_mode = #tpu.pipeline_mode<synchronous>, transform_indices = @transform_1, window_bounds = array<i64: 1, 32>}, {pipeline_mode = #tpu.pipeline_mode<synchronous>, transform_indices = @transform_2, window_bounds = array<i64: 1, 32>}, {pipeline_mode = #tpu.pipeline_mode<synchronous>, transform_indices = @transform_3, window_bounds = array<i64: 2, 32, 96>}, {pipeline_mode = #tpu.pipeline_mode<synchronous>, transform_indices = @transform_4, window_bounds = array<i64: 2, 1, 96>}, {pipeline_mode = #tpu.pipeline_mode<synchronous>, transform_indices = @transform_5, window_bounds = array<i64: 2, 32, 32>}, {pipeline_mode = #tpu.pipeline_mode<synchronous>, transform_indices = @transform_6, window_bounds = array<i64: 2, 1, 32>}, {pipeline_mode = #tpu.pipeline_mode<synchronous>, transform_indices = @transform_7, window_bounds = array<i64: 2, 1, 32>}, {pipeline_mode = #tpu.pipeline_mode<synchronous>, transform_indices = @transform_8, window_bounds = array<i64: 2, 1, 32>}, {pipeline_mode = #tpu.pipeline_mode<synchronous>, transform_indices = @transform_9, window_bounds = array<i64: 2, 32, 64>}, {pipeline_mode = #tpu.pipeline_mode<synchronous>, transform_indices = @transform_10, window_bounds = array<i64: 2, 1, 64>}, {pipeline_mode = #tpu.pipeline_mode<synchronous>, transform_indices = @transform_11, window_bounds = array<i64: 2, 64, 32>}, {pipeline_mode = #tpu.pipeline_mode<synchronous>, transform_indices = @transform_12, window_bounds = array<i64: 2, 1, 32>}, {pipeline_mode = #tpu.pipeline_mode<synchronous>, transform_indices = @transform_13, window_bounds = array<i64: 2, 1, 32>}, {pipeline_mode = #tpu.pipeline_mode<synchronous>, transform_indices = @transform_14, window_bounds = array<i64: 2, 1, 32>}, {pipeline_mode = #tpu.pipeline_mode<synchronous>, transform_indices = @transform_15, window_bounds = array<i64: 32, 32>}, {pipeline_mode = #tpu.pipeline_mode<synchronous>, transform_indices = @transform_16, window_bounds = array<i64: 1, 32>}, {pipeline_mode = #tpu.pipeline_mode<synchronous>, transform_indices = @transform_17, window_bounds = array<i64: 1, 32>}, {pipeline_mode = #tpu.pipeline_mode<synchronous>, transform_indices = @transform_18, window_bounds = array<i64: 1, 1>}, {pipeline_mode = #tpu.pipeline_mode<synchronous>, transform_indices = @transform_19, window_bounds = array<i64: 2, 1>}, {pipeline_mode = #tpu.pipeline_mode<synchronous>, transform_indices = @transform_20, window_bounds = array<i64: 2, 1>}, {transform_indices = @transform_21, window_bounds = array<i64: 1, 1>}]} {
    %c0 = arith.constant 0 : index
    %c0_0 = arith.constant 0 : index
    %0 = vector.load %arg1[%c0, %c0_0] : memref<16x32xf32, #tpu.memory_space<vmem>>, vector<16x32xf32>
    %c0_1 = arith.constant 0 : index
    %c0_2 = arith.constant 0 : index
    %1 = vector.load %arg2[%c0_1, %c0_2] : memref<1x32xf32, #tpu.memory_space<vmem>>, vector<1x32xf32>
    %c0_3 = arith.constant 0 : index
    %c0_4 = arith.constant 0 : index
    %2 = vector.load %arg3[%c0_3, %c0_4] : memref<1x32xf32, #tpu.memory_space<vmem>>, vector<1x32xf32>
    %cst = arith.constant dense<0.000000e+00> : vector<16xf32>
    %3 = vector.multi_reduction <add>, %0, %cst [1] : vector<16x32xf32> to vector<16xf32>
    %4 = vector.shape_cast %3 : vector<16xf32> to vector<16x1xf32>
    %cst_5 = arith.constant 3.200000e+01 : f32
    %5 = vector.broadcast %cst_5 : f32 to vector<16x1xf32>
    %6 = arith.divf %4, %5 : vector<16x1xf32>
    %7 = vector.broadcast %6 : vector<16x1xf32> to vector<16x32xf32>
    %8 = arith.subf %0, %7 : vector<16x32xf32>
    %9 = arith.mulf %8, %8 : vector<16x32xf32>
    %cst_6 = arith.constant dense<0.000000e+00> : vector<16xf32>
    %10 = vector.multi_reduction <add>, %9, %cst_6 [1] : vector<16x32xf32> to vector<16xf32>
    %11 = vector.shape_cast %10 : vector<16xf32> to vector<16x1xf32>
    %cst_7 = arith.constant 3.200000e+01 : f32
    %12 = vector.broadcast %cst_7 : f32 to vector<16x1xf32>
    %13 = arith.divf %11, %12 : vector<16x1xf32>
    %cst_8 = arith.constant 9.99999996E-13 : f32
    %14 = vector.broadcast %cst_8 : f32 to vector<16x1xf32>
    %15 = arith.addf %13, %14 : vector<16x1xf32>
    %16 = math.rsqrt %15 : vector<16x1xf32>
    %17 = vector.broadcast %16 : vector<16x1xf32> to vector<16x32xf32>
    %18 = arith.mulf %8, %17 : vector<16x32xf32>
    %19 = vector.broadcast %1 : vector<1x32xf32> to vector<16x32xf32>
    %20 = arith.mulf %18, %19 : vector<16x32xf32>
    %21 = vector.broadcast %2 : vector<1x32xf32> to vector<16x32xf32>
    %22 = arith.addf %20, %21 : vector<16x32xf32>
    %c0_9 = arith.constant 0 : index
    %c0_10 = arith.constant 0 : index
    %c0_11 = arith.constant 0 : index
    %23 = vector.load %arg4[%c0_9, %c0_10, %c0_11] : memref<2x32x96xf32, #tpu.memory_space<vmem>>, vector<1x32x96xf32>
    %24 = vector.shape_cast %23 : vector<1x32x96xf32> to vector<32x96xf32>
    %25 = arith.truncf %22 : vector<16x32xf32> to vector<16x32xbf16>
    %26 = arith.truncf %24 : vector<32x96xf32> to vector<32x96xbf16>
    %cst_12 = arith.constant dense<0.000000e+00> : vector<16x96xf32>
    %27 = tpu.matmul %25, %26, %cst_12 {dimension_numbers = #tpu.dot_dimension_numbers<[1], [0], [0], [1], [0, 0, 1, 1], [], []>} : vector<16x32xbf16>, vector<32x96xbf16>, vector<16x96xf32> -> vector<16x96xf32>
    %c0_13 = arith.constant 0 : index
    %c0_14 = arith.constant 0 : index
    %c0_15 = arith.constant 0 : index
    %28 = vector.load %arg5[%c0_13, %c0_14, %c0_15] : memref<2x1x96xf32, #tpu.memory_space<vmem>>, vector<1x1x96xf32>
    %29 = vector.shape_cast %28 : vector<1x1x96xf32> to vector<1x96xf32>
    %30 = vector.broadcast %29 : vector<1x96xf32> to vector<16x96xf32>
    %31 = arith.addf %27, %30 : vector<16x96xf32>
    %32 = vector.shape_cast %31 : vector<16x96xf32> to vector<2x8x96xf32>
    %33 = arith.truncf %32 : vector<2x8x96xf32> to vector<2x8x96xbf16>
    %34 = vector.extract_strided_slice %33 {offsets = [0, 0, 0], sizes = [2, 8, 16], strides = [1, 1, 1]} : vector<2x8x96xbf16> to vector<2x8x16xbf16>
    %35 = vector.extract_strided_slice %33 {offsets = [0, 0, 32], sizes = [2, 8, 16], strides = [1, 1, 1]} : vector<2x8x96xbf16> to vector<2x8x16xbf16>
    %36 = vector.extract_strided_slice %33 {offsets = [0, 0, 64], sizes = [2, 8, 16], strides = [1, 1, 1]} : vector<2x8x96xbf16> to vector<2x8x16xbf16>
    %cst_16 = arith.constant dense<0.000000e+00> : vector<2x8x8xf32>
    %37 = tpu.matmul %34, %35, %cst_16 {dimension_numbers = #tpu.dot_dimension_numbers<[2], [2], [1], [1], [0, 0, 0, 1, 1, 1], [0], [0]>} : vector<2x8x16xbf16>, vector<2x8x16xbf16>, vector<2x8x8xf32> -> vector<2x8x8xf32>
    %cst_17 = arith.constant dense<0xFF800000> : vector<2x8xf32>
    %38 = vector.multi_reduction <maximumf>, %37, %cst_17 [2] : vector<2x8x8xf32> to vector<2x8xf32>
    %39 = vector.shape_cast %38 : vector<2x8xf32> to vector<2x8x1xf32>
    %40 = vector.broadcast %39 : vector<2x8x1xf32> to vector<2x8x8xf32>
    %41 = arith.subf %37, %40 : vector<2x8x8xf32>
    %42 = math.exp %41 : vector<2x8x8xf32>
    %cst_18 = arith.constant dense<0.000000e+00> : vector<2x8xf32>
    %43 = vector.multi_reduction <add>, %42, %cst_18 [2] : vector<2x8x8xf32> to vector<2x8xf32>
    %44 = vector.shape_cast %43 : vector<2x8xf32> to vector<2x8x1xf32>
    %45 = tpu.reciprocal %44 {approx = true} : vector<2x8x1xf32> -> vector<2x8x1xf32>
    %46 = vector.broadcast %45 : vector<2x8x1xf32> to vector<2x8x8xf32>
    %47 = arith.mulf %42, %46 : vector<2x8x8xf32>
    %48 = arith.truncf %47 : vector<2x8x8xf32> to vector<2x8x8xbf16>
    %cst_19 = arith.constant dense<0.000000e+00> : vector<2x8x16xf32>
    %49 = tpu.matmul %48, %36, %cst_19 {dimension_numbers = #tpu.dot_dimension_numbers<[2], [1], [1], [2], [0, 0, 0, 1, 1, 2], [0], [0]>} : vector<2x8x8xbf16>, vector<2x8x16xbf16>, vector<2x8x16xf32> -> vector<2x8x16xf32>
    %50 = vector.extract_strided_slice %33 {offsets = [0, 0, 16], sizes = [2, 8, 16], strides = [1, 1, 1]} : vector<2x8x96xbf16> to vector<2x8x16xbf16>
    %51 = vector.extract_strided_slice %33 {offsets = [0, 0, 48], sizes = [2, 8, 16], strides = [1, 1, 1]} : vector<2x8x96xbf16> to vector<2x8x16xbf16>
    %52 = vector.extract_strided_slice %33 {offsets = [0, 0, 80], sizes = [2, 8, 16], strides = [1, 1, 1]} : vector<2x8x96xbf16> to vector<2x8x16xbf16>
    %cst_20 = arith.constant dense<0.000000e+00> : vector<2x8x8xf32>
    %53 = tpu.matmul %50, %51, %cst_20 {dimension_numbers = #tpu.dot_dimension_numbers<[2], [2], [1], [1], [0, 0, 0, 1, 1, 1], [0], [0]>} : vector<2x8x16xbf16>, vector<2x8x16xbf16>, vector<2x8x8xf32> -> vector<2x8x8xf32>
    %cst_21 = arith.constant dense<0xFF800000> : vector<2x8xf32>
    %54 = vector.multi_reduction <maximumf>, %53, %cst_21 [2] : vector<2x8x8xf32> to vector<2x8xf32>
    %55 = vector.shape_cast %54 : vector<2x8xf32> to vector<2x8x1xf32>
    %56 = vector.broadcast %55 : vector<2x8x1xf32> to vector<2x8x8xf32>
    %57 = arith.subf %53, %56 : vector<2x8x8xf32>
    %58 = math.exp %57 : vector<2x8x8xf32>
    %cst_22 = arith.constant dense<0.000000e+00> : vector<2x8xf32>
    %59 = vector.multi_reduction <add>, %58, %cst_22 [2] : vector<2x8x8xf32> to vector<2x8xf32>
    %60 = vector.shape_cast %59 : vector<2x8xf32> to vector<2x8x1xf32>
    %61 = tpu.reciprocal %60 {approx = true} : vector<2x8x1xf32> -> vector<2x8x1xf32>
    %62 = vector.broadcast %61 : vector<2x8x1xf32> to vector<2x8x8xf32>
    %63 = arith.mulf %58, %62 : vector<2x8x8xf32>
    %64 = arith.truncf %63 : vector<2x8x8xf32> to vector<2x8x8xbf16>
    %cst_23 = arith.constant dense<0.000000e+00> : vector<2x8x16xf32>
    %65 = tpu.matmul %64, %52, %cst_23 {dimension_numbers = #tpu.dot_dimension_numbers<[2], [1], [1], [2], [0, 0, 0, 1, 1, 2], [0], [0]>} : vector<2x8x8xbf16>, vector<2x8x16xbf16>, vector<2x8x16xf32> -> vector<2x8x16xf32>
    %66 = tpu.concatenate %49, %65 in 2 : vector<2x8x16xf32>, vector<2x8x16xf32> -> vector<2x8x32xf32>
    %67 = vector.shape_cast %66 : vector<2x8x32xf32> to vector<16x32xf32>
    %c0_24 = arith.constant 0 : index
    %c0_25 = arith.constant 0 : index
    %c0_26 = arith.constant 0 : index
    %68 = vector.load %arg6[%c0_24, %c0_25, %c0_26] : memref<2x32x32xf32, #tpu.memory_space<vmem>>, vector<1x32x32xf32>
    %69 = vector.shape_cast %68 : vector<1x32x32xf32> to vector<32x32xf32>
    %70 = arith.truncf %67 : vector<16x32xf32> to vector<16x32xbf16>
    %71 = arith.truncf %69 : vector<32x32xf32> to vector<32x32xbf16>
    %cst_27 = arith.constant dense<0.000000e+00> : vector<16x32xf32>
    %72 = tpu.matmul %70, %71, %cst_27 {dimension_numbers = #tpu.dot_dimension_numbers<[1], [0], [0], [1], [0, 0, 1, 1], [], []>} : vector<16x32xbf16>, vector<32x32xbf16>, vector<16x32xf32> -> vector<16x32xf32>
    %c0_28 = arith.constant 0 : index
    %c0_29 = arith.constant 0 : index
    %c0_30 = arith.constant 0 : index
    %73 = vector.load %arg7[%c0_28, %c0_29, %c0_30] : memref<2x1x32xf32, #tpu.memory_space<vmem>>, vector<1x1x32xf32>
    %74 = vector.shape_cast %73 : vector<1x1x32xf32> to vector<1x32xf32>
    %75 = vector.broadcast %74 : vector<1x32xf32> to vector<16x32xf32>
    %76 = arith.addf %72, %75 : vector<16x32xf32>
    %77 = arith.addf %76, %22 : vector<16x32xf32>
    %c0_31 = arith.constant 0 : index
    %c0_32 = arith.constant 0 : index
    %c0_33 = arith.constant 0 : index
    %78 = vector.load %arg8[%c0_31, %c0_32, %c0_33] : memref<2x1x32xf32, #tpu.memory_space<vmem>>, vector<1x1x32xf32>
    %79 = vector.shape_cast %78 : vector<1x1x32xf32> to vector<1x32xf32>
    %c0_34 = arith.constant 0 : index
    %c0_35 = arith.constant 0 : index
    %c0_36 = arith.constant 0 : index
    %80 = vector.load %arg9[%c0_34, %c0_35, %c0_36] : memref<2x1x32xf32, #tpu.memory_space<vmem>>, vector<1x1x32xf32>
    %81 = vector.shape_cast %80 : vector<1x1x32xf32> to vector<1x32xf32>
    %cst_37 = arith.constant dense<0.000000e+00> : vector<16xf32>
    %82 = vector.multi_reduction <add>, %77, %cst_37 [1] : vector<16x32xf32> to vector<16xf32>
    %83 = vector.shape_cast %82 : vector<16xf32> to vector<16x1xf32>
    %cst_38 = arith.constant 3.200000e+01 : f32
    %84 = vector.broadcast %cst_38 : f32 to vector<16x1xf32>
    %85 = arith.divf %83, %84 : vector<16x1xf32>
    %86 = vector.broadcast %85 : vector<16x1xf32> to vector<16x32xf32>
    %87 = arith.subf %77, %86 : vector<16x32xf32>
    %88 = arith.mulf %87, %87 : vector<16x32xf32>
    %cst_39 = arith.constant dense<0.000000e+00> : vector<16xf32>
    %89 = vector.multi_reduction <add>, %88, %cst_39 [1] : vector<16x32xf32> to vector<16xf32>
    %90 = vector.shape_cast %89 : vector<16xf32> to vector<16x1xf32>
    %cst_40 = arith.constant 3.200000e+01 : f32
    %91 = vector.broadcast %cst_40 : f32 to vector<16x1xf32>
    %92 = arith.divf %90, %91 : vector<16x1xf32>
    %cst_41 = arith.constant 9.99999996E-13 : f32
    %93 = vector.broadcast %cst_41 : f32 to vector<16x1xf32>
    %94 = arith.addf %92, %93 : vector<16x1xf32>
    %95 = math.rsqrt %94 : vector<16x1xf32>
    %96 = vector.broadcast %95 : vector<16x1xf32> to vector<16x32xf32>
    %97 = arith.mulf %87, %96 : vector<16x32xf32>
    %98 = vector.broadcast %79 : vector<1x32xf32> to vector<16x32xf32>
    %99 = arith.mulf %97, %98 : vector<16x32xf32>
    %100 = vector.broadcast %81 : vector<1x32xf32> to vector<16x32xf32>
    %101 = arith.addf %99, %100 : vector<16x32xf32>
    %c0_42 = arith.constant 0 : index
    %c0_43 = arith.constant 0 : index
    %c0_44 = arith.constant 0 : index
    %102 = vector.load %arg10[%c0_42, %c0_43, %c0_44] : memref<2x32x64xf32, #tpu.memory_space<vmem>>, vector<1x32x64xf32>
    %103 = vector.shape_cast %102 : vector<1x32x64xf32> to vector<32x64xf32>
    %104 = arith.truncf %101 : vector<16x32xf32> to vector<16x32xbf16>
    %105 = arith.truncf %103 : vector<32x64xf32> to vector<32x64xbf16>
    %cst_45 = arith.constant dense<0.000000e+00> : vector<16x64xf32>
    %106 = tpu.matmul %104, %105, %cst_45 {dimension_numbers = #tpu.dot_dimension_numbers<[1], [0], [0], [1], [0, 0, 1, 1], [], []>} : vector<16x32xbf16>, vector<32x64xbf16>, vector<16x64xf32> -> vector<16x64xf32>
    %c0_46 = arith.constant 0 : index
    %c0_47 = arith.constant 0 : index
    %c0_48 = arith.constant 0 : index
    %107 = vector.load %arg11[%c0_46, %c0_47, %c0_48] : memref<2x1x64xf32, #tpu.memory_space<vmem>>, vector<1x1x64xf32>
    %108 = vector.shape_cast %107 : vector<1x1x64xf32> to vector<1x64xf32>
    %109 = vector.broadcast %108 : vector<1x64xf32> to vector<16x64xf32>
    %110 = arith.addf %106, %109 : vector<16x64xf32>
    %111 = arith.mulf %110, %110 : vector<16x64xf32>
    %112 = arith.mulf %110, %111 : vector<16x64xf32>
    %cst_49 = arith.constant 4.471500e-02 : f32
    %113 = vector.broadcast %cst_49 : f32 to vector<16x64xf32>
    %114 = arith.mulf %113, %112 : vector<16x64xf32>
    %115 = arith.addf %110, %114 : vector<16x64xf32>
    %cst_50 = arith.constant 0.797884583 : f32
    %116 = vector.broadcast %cst_50 : f32 to vector<16x64xf32>
    %117 = arith.mulf %116, %115 : vector<16x64xf32>
    %118 = math.tanh %117 : vector<16x64xf32>
    %cst_51 = arith.constant 1.000000e+00 : f32
    %119 = vector.broadcast %cst_51 : f32 to vector<16x64xf32>
    %120 = arith.addf %119, %118 : vector<16x64xf32>
    %cst_52 = arith.constant 5.000000e-01 : f32
    %121 = vector.broadcast %cst_52 : f32 to vector<16x64xf32>
    %122 = arith.mulf %121, %120 : vector<16x64xf32>
    %123 = arith.mulf %110, %122 : vector<16x64xf32>
    %c0_53 = arith.constant 0 : index
    %c0_54 = arith.constant 0 : index
    %c0_55 = arith.constant 0 : index
    %124 = vector.load %arg12[%c0_53, %c0_54, %c0_55] : memref<2x64x32xf32, #tpu.memory_space<vmem>>, vector<1x64x32xf32>
    %125 = vector.shape_cast %124 : vector<1x64x32xf32> to vector<64x32xf32>
    %126 = arith.truncf %123 : vector<16x64xf32> to vector<16x64xbf16>
    %127 = arith.truncf %125 : vector<64x32xf32> to vector<64x32xbf16>
    %cst_56 = arith.constant dense<0.000000e+00> : vector<16x32xf32>
    %128 = tpu.matmul %126, %127, %cst_56 {dimension_numbers = #tpu.dot_dimension_numbers<[1], [0], [0], [1], [0, 0, 1, 1], [], []>} : vector<16x64xbf16>, vector<64x32xbf16>, vector<16x32xf32> -> vector<16x32xf32>
    %c0_57 = arith.constant 0 : index
    %c0_58 = arith.constant 0 : index
    %c0_59 = arith.constant 0 : index
    %129 = vector.load %arg13[%c0_57, %c0_58, %c0_59] : memref<2x1x32xf32, #tpu.memory_space<vmem>>, vector<1x1x32xf32>
    %130 = vector.shape_cast %129 : vector<1x1x32xf32> to vector<1x32xf32>
    %131 = vector.broadcast %130 : vector<1x32xf32> to vector<16x32xf32>
    %132 = arith.addf %128, %131 : vector<16x32xf32>
    %133 = arith.addf %132, %101 : vector<16x32xf32>
    %c0_60 = arith.constant 0 : index
    %c0_61 = arith.constant 0 : index
    %c0_62 = arith.constant 0 : index
    %134 = vector.load %arg14[%c0_60, %c0_61, %c0_62] : memref<2x1x32xf32, #tpu.memory_space<vmem>>, vector<1x1x32xf32>
    %135 = vector.shape_cast %134 : vector<1x1x32xf32> to vector<1x32xf32>
    %c0_63 = arith.constant 0 : index
    %c0_64 = arith.constant 0 : index
    %c0_65 = arith.constant 0 : index
    %136 = vector.load %arg15[%c0_63, %c0_64, %c0_65] : memref<2x1x32xf32, #tpu.memory_space<vmem>>, vector<1x1x32xf32>
    %137 = vector.shape_cast %136 : vector<1x1x32xf32> to vector<1x32xf32>
    %cst_66 = arith.constant dense<0.000000e+00> : vector<16xf32>
    %138 = vector.multi_reduction <add>, %133, %cst_66 [1] : vector<16x32xf32> to vector<16xf32>
    %139 = vector.shape_cast %138 : vector<16xf32> to vector<16x1xf32>
    %cst_67 = arith.constant 3.200000e+01 : f32
    %140 = vector.broadcast %cst_67 : f32 to vector<16x1xf32>
    %141 = arith.divf %139, %140 : vector<16x1xf32>
    %142 = vector.broadcast %141 : vector<16x1xf32> to vector<16x32xf32>
    %143 = arith.subf %133, %142 : vector<16x32xf32>
    %144 = arith.mulf %143, %143 : vector<16x32xf32>
    %cst_68 = arith.constant dense<0.000000e+00> : vector<16xf32>
    %145 = vector.multi_reduction <add>, %144, %cst_68 [1] : vector<16x32xf32> to vector<16xf32>
    %146 = vector.shape_cast %145 : vector<16xf32> to vector<16x1xf32>
    %cst_69 = arith.constant 3.200000e+01 : f32
    %147 = vector.broadcast %cst_69 : f32 to vector<16x1xf32>
    %148 = arith.divf %146, %147 : vector<16x1xf32>
    %cst_70 = arith.constant 9.99999996E-13 : f32
    %149 = vector.broadcast %cst_70 : f32 to vector<16x1xf32>
    %150 = arith.addf %148, %149 : vector<16x1xf32>
    %151 = math.rsqrt %150 : vector<16x1xf32>
    %152 = vector.broadcast %151 : vector<16x1xf32> to vector<16x32xf32>
    %153 = arith.mulf %143, %152 : vector<16x32xf32>
    %154 = vector.broadcast %135 : vector<1x32xf32> to vector<16x32xf32>
    %155 = arith.mulf %153, %154 : vector<16x32xf32>
    %156 = vector.broadcast %137 : vector<1x32xf32> to vector<16x32xf32>
    %157 = arith.addf %155, %156 : vector<16x32xf32>
    %c1 = arith.constant 1 : index
    %c0_71 = arith.constant 0 : index
    %c0_72 = arith.constant 0 : index
    %158 = vector.load %arg4[%c1, %c0_71, %c0_72] : memref<2x32x96xf32, #tpu.memory_space<vmem>>, vector<1x32x96xf32>
    %159 = vector.shape_cast %158 : vector<1x32x96xf32> to vector<32x96xf32>
    %160 = arith.truncf %157 : vector<16x32xf32> to vector<16x32xbf16>
    %161 = arith.truncf %159 : vector<32x96xf32> to vector<32x96xbf16>
    %cst_73 = arith.constant dense<0.000000e+00> : vector<16x96xf32>
    %162 = tpu.matmul %160, %161, %cst_73 {dimension_numbers = #tpu.dot_dimension_numbers<[1], [0], [0], [1], [0, 0, 1, 1], [], []>} : vector<16x32xbf16>, vector<32x96xbf16>, vector<16x96xf32> -> vector<16x96xf32>
    %c1_74 = arith.constant 1 : index
    %c0_75 = arith.constant 0 : index
    %c0_76 = arith.constant 0 : index
    %163 = vector.load %arg5[%c1_74, %c0_75, %c0_76] : memref<2x1x96xf32, #tpu.memory_space<vmem>>, vector<1x1x96xf32>
    %164 = vector.shape_cast %163 : vector<1x1x96xf32> to vector<1x96xf32>
    %165 = vector.broadcast %164 : vector<1x96xf32> to vector<16x96xf32>
    %166 = arith.addf %162, %165 : vector<16x96xf32>
    %167 = vector.shape_cast %166 : vector<16x96xf32> to vector<2x8x96xf32>
    %168 = arith.truncf %167 : vector<2x8x96xf32> to vector<2x8x96xbf16>
    %169 = vector.extract_strided_slice %168 {offsets = [0, 0, 0], sizes = [2, 8, 16], strides = [1, 1, 1]} : vector<2x8x96xbf16> to vector<2x8x16xbf16>
    %170 = vector.extract_strided_slice %168 {offsets = [0, 0, 32], sizes = [2, 8, 16], strides = [1, 1, 1]} : vector<2x8x96xbf16> to vector<2x8x16xbf16>
    %171 = vector.extract_strided_slice %168 {offsets = [0, 0, 64], sizes = [2, 8, 16], strides = [1, 1, 1]} : vector<2x8x96xbf16> to vector<2x8x16xbf16>
    %cst_77 = arith.constant dense<0.000000e+00> : vector<2x8x8xf32>
    %172 = tpu.matmul %169, %170, %cst_77 {dimension_numbers = #tpu.dot_dimension_numbers<[2], [2], [1], [1], [0, 0, 0, 1, 1, 1], [0], [0]>} : vector<2x8x16xbf16>, vector<2x8x16xbf16>, vector<2x8x8xf32> -> vector<2x8x8xf32>
    %cst_78 = arith.constant dense<0xFF800000> : vector<2x8xf32>
    %173 = vector.multi_reduction <maximumf>, %172, %cst_78 [2] : vector<2x8x8xf32> to vector<2x8xf32>
    %174 = vector.shape_cast %173 : vector<2x8xf32> to vector<2x8x1xf32>
    %175 = vector.broadcast %174 : vector<2x8x1xf32> to vector<2x8x8xf32>
    %176 = arith.subf %172, %175 : vector<2x8x8xf32>
    %177 = math.exp %176 : vector<2x8x8xf32>
    %cst_79 = arith.constant dense<0.000000e+00> : vector<2x8xf32>
    %178 = vector.multi_reduction <add>, %177, %cst_79 [2] : vector<2x8x8xf32> to vector<2x8xf32>
    %179 = vector.shape_cast %178 : vector<2x8xf32> to vector<2x8x1xf32>
    %180 = tpu.reciprocal %179 {approx = true} : vector<2x8x1xf32> -> vector<2x8x1xf32>
    %181 = vector.broadcast %180 : vector<2x8x1xf32> to vector<2x8x8xf32>
    %182 = arith.mulf %177, %181 : vector<2x8x8xf32>
    %183 = arith.truncf %182 : vector<2x8x8xf32> to vector<2x8x8xbf16>
    %cst_80 = arith.constant dense<0.000000e+00> : vector<2x8x16xf32>
    %184 = tpu.matmul %183, %171, %cst_80 {dimension_numbers = #tpu.dot_dimension_numbers<[2], [1], [1], [2], [0, 0, 0, 1, 1, 2], [0], [0]>} : vector<2x8x8xbf16>, vector<2x8x16xbf16>, vector<2x8x16xf32> -> vector<2x8x16xf32>
    %185 = vector.extract_strided_slice %168 {offsets = [0, 0, 16], sizes = [2, 8, 16], strides = [1, 1, 1]} : vector<2x8x96xbf16> to vector<2x8x16xbf16>
    %186 = vector.extract_strided_slice %168 {offsets = [0, 0, 48], sizes = [2, 8, 16], strides = [1, 1, 1]} : vector<2x8x96xbf16> to vector<2x8x16xbf16>
    %187 = vector.extract_strided_slice %168 {offsets = [0, 0, 80], sizes = [2, 8, 16], strides = [1, 1, 1]} : vector<2x8x96xbf16> to vector<2x8x16xbf16>
    %cst_81 = arith.constant dense<0.000000e+00> : vector<2x8x8xf32>
    %188 = tpu.matmul %185, %186, %cst_81 {dimension_numbers = #tpu.dot_dimension_numbers<[2], [2], [1], [1], [0, 0, 0, 1, 1, 1], [0], [0]>} : vector<2x8x16xbf16>, vector<2x8x16xbf16>, vector<2x8x8xf32> -> vector<2x8x8xf32>
    %cst_82 = arith.constant dense<0xFF800000> : vector<2x8xf32>
    %189 = vector.multi_reduction <maximumf>, %188, %cst_82 [2] : vector<2x8x8xf32> to vector<2x8xf32>
    %190 = vector.shape_cast %189 : vector<2x8xf32> to vector<2x8x1xf32>
    %191 = vector.broadcast %190 : vector<2x8x1xf32> to vector<2x8x8xf32>
    %192 = arith.subf %188, %191 : vector<2x8x8xf32>
    %193 = math.exp %192 : vector<2x8x8xf32>
    %cst_83 = arith.constant dense<0.000000e+00> : vector<2x8xf32>
    %194 = vector.multi_reduction <add>, %193, %cst_83 [2] : vector<2x8x8xf32> to vector<2x8xf32>
    %195 = vector.shape_cast %194 : vector<2x8xf32> to vector<2x8x1xf32>
    %196 = tpu.reciprocal %195 {approx = true} : vector<2x8x1xf32> -> vector<2x8x1xf32>
    %197 = vector.broadcast %196 : vector<2x8x1xf32> to vector<2x8x8xf32>
    %198 = arith.mulf %193, %197 : vector<2x8x8xf32>
    %199 = arith.truncf %198 : vector<2x8x8xf32> to vector<2x8x8xbf16>
    %cst_84 = arith.constant dense<0.000000e+00> : vector<2x8x16xf32>
    %200 = tpu.matmul %199, %187, %cst_84 {dimension_numbers = #tpu.dot_dimension_numbers<[2], [1], [1], [2], [0, 0, 0, 1, 1, 2], [0], [0]>} : vector<2x8x8xbf16>, vector<2x8x16xbf16>, vector<2x8x16xf32> -> vector<2x8x16xf32>
    %201 = tpu.concatenate %184, %200 in 2 : vector<2x8x16xf32>, vector<2x8x16xf32> -> vector<2x8x32xf32>
    %202 = vector.shape_cast %201 : vector<2x8x32xf32> to vector<16x32xf32>
    %c1_85 = arith.constant 1 : index
    %c0_86 = arith.constant 0 : index
    %c0_87 = arith.constant 0 : index
    %203 = vector.load %arg6[%c1_85, %c0_86, %c0_87] : memref<2x32x32xf32, #tpu.memory_space<vmem>>, vector<1x32x32xf32>
    %204 = vector.shape_cast %203 : vector<1x32x32xf32> to vector<32x32xf32>
    %205 = arith.truncf %202 : vector<16x32xf32> to vector<16x32xbf16>
    %206 = arith.truncf %204 : vector<32x32xf32> to vector<32x32xbf16>
    %cst_88 = arith.constant dense<0.000000e+00> : vector<16x32xf32>
    %207 = tpu.matmul %205, %206, %cst_88 {dimension_numbers = #tpu.dot_dimension_numbers<[1], [0], [0], [1], [0, 0, 1, 1], [], []>} : vector<16x32xbf16>, vector<32x32xbf16>, vector<16x32xf32> -> vector<16x32xf32>
    %c1_89 = arith.constant 1 : index
    %c0_90 = arith.constant 0 : index
    %c0_91 = arith.constant 0 : index
    %208 = vector.load %arg7[%c1_89, %c0_90, %c0_91] : memref<2x1x32xf32, #tpu.memory_space<vmem>>, vector<1x1x32xf32>
    %209 = vector.shape_cast %208 : vector<1x1x32xf32> to vector<1x32xf32>
    %210 = vector.broadcast %209 : vector<1x32xf32> to vector<16x32xf32>
    %211 = arith.addf %207, %210 : vector<16x32xf32>
    %212 = arith.addf %211, %157 : vector<16x32xf32>
    %c1_92 = arith.constant 1 : index
    %c0_93 = arith.constant 0 : index
    %c0_94 = arith.constant 0 : index
    %213 = vector.load %arg8[%c1_92, %c0_93, %c0_94] : memref<2x1x32xf32, #tpu.memory_space<vmem>>, vector<1x1x32xf32>
    %214 = vector.shape_cast %213 : vector<1x1x32xf32> to vector<1x32xf32>
    %c1_95 = arith.constant 1 : index
    %c0_96 = arith.constant 0 : index
    %c0_97 = arith.constant 0 : index
    %215 = vector.load %arg9[%c1_95, %c0_96, %c0_97] : memref<2x1x32xf32, #tpu.memory_space<vmem>>, vector<1x1x32xf32>
    %216 = vector.shape_cast %215 : vector<1x1x32xf32> to vector<1x32xf32>
    %cst_98 = arith.constant dense<0.000000e+00> : vector<16xf32>
    %217 = vector.multi_reduction <add>, %212, %cst_98 [1] : vector<16x32xf32> to vector<16xf32>
    %218 = vector.shape_cast %217 : vector<16xf32> to vector<16x1xf32>
    %cst_99 = arith.constant 3.200000e+01 : f32
    %219 = vector.broadcast %cst_99 : f32 to vector<16x1xf32>
    %220 = arith.divf %218, %219 : vector<16x1xf32>
    %221 = vector.broadcast %220 : vector<16x1xf32> to vector<16x32xf32>
    %222 = arith.subf %212, %221 : vector<16x32xf32>
    %223 = arith.mulf %222, %222 : vector<16x32xf32>
    %cst_100 = arith.constant dense<0.000000e+00> : vector<16xf32>
    %224 = vector.multi_reduction <add>, %223, %cst_100 [1] : vector<16x32xf32> to vector<16xf32>
    %225 = vector.shape_cast %224 : vector<16xf32> to vector<16x1xf32>
    %cst_101 = arith.constant 3.200000e+01 : f32
    %226 = vector.broadcast %cst_101 : f32 to vector<16x1xf32>
    %227 = arith.divf %225, %226 : vector<16x1xf32>
    %cst_102 = arith.constant 9.99999996E-13 : f32
    %228 = vector.broadcast %cst_102 : f32 to vector<16x1xf32>
    %229 = arith.addf %227, %228 : vector<16x1xf32>
    %230 = math.rsqrt %229 : vector<16x1xf32>
    %231 = vector.broadcast %230 : vector<16x1xf32> to vector<16x32xf32>
    %232 = arith.mulf %222, %231 : vector<16x32xf32>
    %233 = vector.broadcast %214 : vector<1x32xf32> to vector<16x32xf32>
    %234 = arith.mulf %232, %233 : vector<16x32xf32>
    %235 = vector.broadcast %216 : vector<1x32xf32> to vector<16x32xf32>
    %236 = arith.addf %234, %235 : vector<16x32xf32>
    %c1_103 = arith.constant 1 : index
    %c0_104 = arith.constant 0 : index
    %c0_105 = arith.constant 0 : index
    %237 = vector.load %arg10[%c1_103, %c0_104, %c0_105] : memref<2x32x64xf32, #tpu.memory_space<vmem>>, vector<1x32x64xf32>
    %238 = vector.shape_cast %237 : vector<1x32x64xf32> to vector<32x64xf32>
    %239 = arith.truncf %236 : vector<16x32xf32> to vector<16x32xbf16>
    %240 = arith.truncf %238 : vector<32x64xf32> to vector<32x64xbf16>
    %cst_106 = arith.constant dense<0.000000e+00> : vector<16x64xf32>
    %241 = tpu.matmul %239, %240, %cst_106 {dimension_numbers = #tpu.dot_dimension_numbers<[1], [0], [0], [1], [0, 0, 1, 1], [], []>} : vector<16x32xbf16>, vector<32x64xbf16>, vector<16x64xf32> -> vector<16x64xf32>
    %c1_107 = arith.constant 1 : index
    %c0_108 = arith.constant 0 : index
    %c0_109 = arith.constant 0 : index
    %242 = vector.load %arg11[%c1_107, %c0_108, %c0_109] : memref<2x1x64xf32, #tpu.memory_space<vmem>>, vector<1x1x64xf32>
    %243 = vector.shape_cast %242 : vector<1x1x64xf32> to vector<1x64xf32>
    %244 = vector.broadcast %243 : vector<1x64xf32> to vector<16x64xf32>
    %245 = arith.addf %241, %244 : vector<16x64xf32>
    %246 = arith.mulf %245, %245 : vector<16x64xf32>
    %247 = arith.mulf %245, %246 : vector<16x64xf32>
    %cst_110 = arith.constant 4.471500e-02 : f32
    %248 = vector.broadcast %cst_110 : f32 to vector<16x64xf32>
    %249 = arith.mulf %248, %247 : vector<16x64xf32>
    %250 = arith.addf %245, %249 : vector<16x64xf32>
    %cst_111 = arith.constant 0.797884583 : f32
    %251 = vector.broadcast %cst_111 : f32 to vector<16x64xf32>
    %252 = arith.mulf %251, %250 : vector<16x64xf32>
    %253 = math.tanh %252 : vector<16x64xf32>
    %cst_112 = arith.constant 1.000000e+00 : f32
    %254 = vector.broadcast %cst_112 : f32 to vector<16x64xf32>
    %255 = arith.addf %254, %253 : vector<16x64xf32>
    %cst_113 = arith.constant 5.000000e-01 : f32
    %256 = vector.broadcast %cst_113 : f32 to vector<16x64xf32>
    %257 = arith.mulf %256, %255 : vector<16x64xf32>
    %258 = arith.mulf %245, %257 : vector<16x64xf32>
    %c1_114 = arith.constant 1 : index
    %c0_115 = arith.constant 0 : index
    %c0_116 = arith.constant 0 : index
    %259 = vector.load %arg12[%c1_114, %c0_115, %c0_116] : memref<2x64x32xf32, #tpu.memory_space<vmem>>, vector<1x64x32xf32>
    %260 = vector.shape_cast %259 : vector<1x64x32xf32> to vector<64x32xf32>
    %261 = arith.truncf %258 : vector<16x64xf32> to vector<16x64xbf16>
    %262 = arith.truncf %260 : vector<64x32xf32> to vector<64x32xbf16>
    %cst_117 = arith.constant dense<0.000000e+00> : vector<16x32xf32>
    %263 = tpu.matmul %261, %262, %cst_117 {dimension_numbers = #tpu.dot_dimension_numbers<[1], [0], [0], [1], [0, 0, 1, 1], [], []>} : vector<16x64xbf16>, vector<64x32xbf16>, vector<16x32xf32> -> vector<16x32xf32>
    %c1_118 = arith.constant 1 : index
    %c0_119 = arith.constant 0 : index
    %c0_120 = arith.constant 0 : index
    %264 = vector.load %arg13[%c1_118, %c0_119, %c0_120] : memref<2x1x32xf32, #tpu.memory_space<vmem>>, vector<1x1x32xf32>
    %265 = vector.shape_cast %264 : vector<1x1x32xf32> to vector<1x32xf32>
    %266 = vector.broadcast %265 : vector<1x32xf32> to vector<16x32xf32>
    %267 = arith.addf %263, %266 : vector<16x32xf32>
    %268 = arith.addf %267, %236 : vector<16x32xf32>
    %c1_121 = arith.constant 1 : index
    %c0_122 = arith.constant 0 : index
    %c0_123 = arith.constant 0 : index
    %269 = vector.load %arg14[%c1_121, %c0_122, %c0_123] : memref<2x1x32xf32, #tpu.memory_space<vmem>>, vector<1x1x32xf32>
    %270 = vector.shape_cast %269 : vector<1x1x32xf32> to vector<1x32xf32>
    %c1_124 = arith.constant 1 : index
    %c0_125 = arith.constant 0 : index
    %c0_126 = arith.constant 0 : index
    %271 = vector.load %arg15[%c1_124, %c0_125, %c0_126] : memref<2x1x32xf32, #tpu.memory_space<vmem>>, vector<1x1x32xf32>
    %272 = vector.shape_cast %271 : vector<1x1x32xf32> to vector<1x32xf32>
    %cst_127 = arith.constant dense<0.000000e+00> : vector<16xf32>
    %273 = vector.multi_reduction <add>, %268, %cst_127 [1] : vector<16x32xf32> to vector<16xf32>
    %274 = vector.shape_cast %273 : vector<16xf32> to vector<16x1xf32>
    %cst_128 = arith.constant 3.200000e+01 : f32
    %275 = vector.broadcast %cst_128 : f32 to vector<16x1xf32>
    %276 = arith.divf %274, %275 : vector<16x1xf32>
    %277 = vector.broadcast %276 : vector<16x1xf32> to vector<16x32xf32>
    %278 = arith.subf %268, %277 : vector<16x32xf32>
    %279 = arith.mulf %278, %278 : vector<16x32xf32>
    %cst_129 = arith.constant dense<0.000000e+00> : vector<16xf32>
    %280 = vector.multi_reduction <add>, %279, %cst_129 [1] : vector<16x32xf32> to vector<16xf32>
    %281 = vector.shape_cast %280 : vector<16xf32> to vector<16x1xf32>
    %cst_130 = arith.constant 3.200000e+01 : f32
    %282 = vector.broadcast %cst_130 : f32 to vector<16x1xf32>
    %283 = arith.divf %281, %282 : vector<16x1xf32>
    %cst_131 = arith.constant 9.99999996E-13 : f32
    %284 = vector.broadcast %cst_131 : f32 to vector<16x1xf32>
    %285 = arith.addf %283, %284 : vector<16x1xf32>
    %286 = math.rsqrt %285 : vector<16x1xf32>
    %287 = vector.broadcast %286 : vector<16x1xf32> to vector<16x32xf32>
    %288 = arith.mulf %278, %287 : vector<16x32xf32>
    %289 = vector.broadcast %270 : vector<1x32xf32> to vector<16x32xf32>
    %290 = arith.mulf %288, %289 : vector<16x32xf32>
    %291 = vector.broadcast %272 : vector<1x32xf32> to vector<16x32xf32>
    %292 = arith.addf %290, %291 : vector<16x32xf32>
    %293 = vector.shape_cast %292 : vector<16x32xf32> to vector<2x8x32xf32>
    %294 = vector.extract_strided_slice %293 {offsets = [0, 0, 0], sizes = [2, 1, 32], strides = [1, 1, 1]} : vector<2x8x32xf32> to vector<2x1x32xf32>
    %295 = vector.shape_cast %294 : vector<2x1x32xf32> to vector<2x32xf32>
    %c0_132 = arith.constant 0 : index
    %c0_133 = arith.constant 0 : index
    %296 = vector.load %arg16[%c0_132, %c0_133] : memref<32x32xf32, #tpu.memory_space<vmem>>, vector<32x32xf32>
    %297 = arith.truncf %295 : vector<2x32xf32> to vector<2x32xbf16>
    %298 = arith.truncf %296 : vector<32x32xf32> to vector<32x32xbf16>
    %cst_134 = arith.constant dense<0.000000e+00> : vector<2x32xf32>
    %299 = tpu.matmul %297, %298, %cst_134 {dimension_numbers = #tpu.dot_dimension_numbers<[1], [0], [0], [1], [0, 0, 1, 1], [], []>} : vector<2x32xbf16>, vector<32x32xbf16>, vector<2x32xf32> -> vector<2x32xf32>
    %c0_135 = arith.constant 0 : index
    %c0_136 = arith.constant 0 : index
    %300 = vector.load %arg17[%c0_135, %c0_136] : memref<1x32xf32, #tpu.memory_space<vmem>>, vector<1x32xf32>
    %301 = vector.broadcast %300 : vector<1x32xf32> to vector<2x32xf32>
    %302 = arith.addf %299, %301 : vector<2x32xf32>
    %303 = math.tanh %302 : vector<2x32xf32>
    %c0_137 = arith.constant 0 : index
    %c0_138 = arith.constant 0 : index
    %304 = vector.load %arg18[%c0_137, %c0_138] : memref<1x32xf32, #tpu.memory_space<vmem>>, vector<1x32xf32>
    %305 = vector.broadcast %304 : vector<1x32xf32> to vector<2x32xf32>
    %306 = arith.mulf %303, %305 : vector<2x32xf32>
    %cst_139 = arith.constant dense<0.000000e+00> : vector<2xf32>
    %307 = vector.multi_reduction <add>, %306, %cst_139 [1] : vector<2x32xf32> to vector<2xf32>
    %308 = vector.shape_cast %307 : vector<2xf32> to vector<2x1xf32>
    %c0_140 = arith.constant 0 : index
    %c0_141 = arith.constant 0 : index
    %309 = vector.load %arg19[%c0_140, %c0_141] : memref<1x1xf32, #tpu.memory_space<vmem>>, vector<1x1xf32>
    %310 = vector.broadcast %309 : vector<1x1xf32> to vector<2x1xf32>
    %311 = arith.addf %308, %310 : vector<2x1xf32>
    %c0_142 = arith.constant 0 : index
    %c0_143 = arith.constant 0 : index
    %312 = vector.load %arg21[%c0_142, %c0_143] : memref<2x1xf32, #tpu.memory_space<vmem>>, vector<2x1xf32>
    tpu.vector_store %arg21[%c0_142, %c0_143], %311 {strides = array<i32>} : memref<2x1xf32, #tpu.memory_space<vmem>>, vector<2x1xf32>,
    %c0_144 = arith.constant 0 : index
    %c0_145 = arith.constant 0 : index
    %313 = vector.load %arg20[%c0_144, %c0_145] : memref<2x1xf32, #tpu.memory_space<vmem>>, vector<2x1xf32>
    %314 = arith.subf %311, %313 : vector<2x1xf32>
    %315 = arith.mulf %314, %314 : vector<2x1xf32>
    %316 = vector.shape_cast %315 : vector<2x1xf32> to vector<1x2x1xf32>
    %cst_146 = arith.constant dense<0.000000e+00> : vector<1xf32>
    %317 = vector.multi_reduction <add>, %316, %cst_146 [1, 2] : vector<1x2x1xf32> to vector<1xf32>
    %318 = vector.shape_cast %317 : vector<1xf32> to vector<1x1x1xf32>
    %319 = vector.extract %318[0, 0, 0] : f32 from vector<1x1x1xf32>
    %cst_147 = arith.constant 2.000000e+00 : f32
    %320 = arith.divf %319, %cst_147 : f32
    %c0_148 = arith.constant 0 : index
    %c0_149 = arith.constant 0 : index
    %321 = memref.load %arg22[%c0_148, %c0_149] : memref<1x1xf32, #tpu.memory_space<smem>>
    memref.store %320, %arg22[%c0_148, %c0_149] : memref<1x1xf32, #tpu.memory_space<smem>>
    return
  }
  func.func @transform_0(%arg0: i32) -> (i32, i32) {
    %c0_i32 = arith.constant 0 : i32
    %c0_i32_0 = arith.constant 0 : i32
    %c0_i32_1 = arith.constant 0 : i32
    return %c0_i32, %c0_i32_0 : i32, i32
  }
  func.func @transform_1(%arg0: i32) -> (i32, i32) {
    %c0_i32 = arith.constant 0 : i32
    %c0_i32_0 = arith.constant 0 : i32
    %c0_i32_1 = arith.constant 0 : i32
    return %c0_i32, %c0_i32_0 : i32, i32
  }
  func.func @transform_2(%arg0: i32) -> (i32, i32) {
    %c0_i32 = arith.constant 0 : i32
    %c0_i32_0 = arith.constant 0 : i32
    %c0_i32_1 = arith.constant 0 : i32
    return %c0_i32, %c0_i32_0 : i32, i32
  }
  func.func @transform_3(%arg0: i32) -> (i32, i32, i32) {
    %c0_i32 = arith.constant 0 : i32
    %c0_i32_0 = arith.constant 0 : i32
    %c0_i32_1 = arith.constant 0 : i32
    %c0_i32_2 = arith.constant 0 : i32
    return %c0_i32, %c0_i32_0, %c0_i32_1 : i32, i32, i32
  }
  func.func @transform_4(%arg0: i32) -> (i32, i32, i32) {
    %c0_i32 = arith.constant 0 : i32
    %c0_i32_0 = arith.constant 0 : i32
    %c0_i32_1 = arith.constant 0 : i32
    %c0_i32_2 = arith.constant 0 : i32
    return %c0_i32, %c0_i32_0, %c0_i32_1 : i32, i32, i32
  }
  func.func @transform_5(%arg0: i32) -> (i32, i32, i32) {
    %c0_i32 = arith.constant 0 : i32
    %c0_i32_0 = arith.constant 0 : i32
    %c0_i32_1 = arith.constant 0 : i32
    %c0_i32_2 = arith.constant 0 : i32
    return %c0_i32, %c0_i32_0, %c0_i32_1 : i32, i32, i32
  }
  func.func @transform_6(%arg0: i32) -> (i32, i32, i32) {
    %c0_i32 = arith.constant 0 : i32
    %c0_i32_0 = arith.constant 0 : i32
    %c0_i32_1 = arith.constant 0 : i32
    %c0_i32_2 = arith.constant 0 : i32
    return %c0_i32, %c0_i32_0, %c0_i32_1 : i32, i32, i32
  }
  func.func @transform_7(%arg0: i32) -> (i32, i32, i32) {
    %c0_i32 = arith.constant 0 : i32
    %c0_i32_0 = arith.constant 0 : i32
    %c0_i32_1 = arith.constant 0 : i32
    %c0_i32_2 = arith.constant 0 : i32
    return %c0_i32, %c0_i32_0, %c0_i32_1 : i32, i32, i32
  }
  func.func @transform_8(%arg0: i32) -> (i32, i32, i32) {
    %c0_i32 = arith.constant 0 : i32
    %c0_i32_0 = arith.constant 0 : i32
    %c0_i32_1 = arith.constant 0 : i32
    %c0_i32_2 = arith.constant 0 : i32
    return %c0_i32, %c0_i32_0, %c0_i32_1 : i32, i32, i32
  }
  func.func @transform_9(%arg0: i32) -> (i32, i32, i32) {
    %c0_i32 = arith.constant 0 : i32
    %c0_i32_0 = arith.constant 0 : i32
    %c0_i32_1 = arith.constant 0 : i32
    %c0_i32_2 = arith.constant 0 : i32
    return %c0_i32, %c0_i32_0, %c0_i32_1 : i32, i32, i32
  }
  func.func @transform_10(%arg0: i32) -> (i32, i32, i32) {
    %c0_i32 = arith.constant 0 : i32
    %c0_i32_0 = arith.constant 0 : i32
    %c0_i32_1 = arith.constant 0 : i32
    %c0_i32_2 = arith.constant 0 : i32
    return %c0_i32, %c0_i32_0, %c0_i32_1 : i32, i32, i32
  }
  func.func @transform_11(%arg0: i32) -> (i32, i32, i32) {
    %c0_i32 = arith.constant 0 : i32
    %c0_i32_0 = arith.constant 0 : i32
    %c0_i32_1 = arith.constant 0 : i32
    %c0_i32_2 = arith.constant 0 : i32
    return %c0_i32, %c0_i32_0, %c0_i32_1 : i32, i32, i32
  }
  func.func @transform_12(%arg0: i32) -> (i32, i32, i32) {
    %c0_i32 = arith.constant 0 : i32
    %c0_i32_0 = arith.constant 0 : i32
    %c0_i32_1 = arith.constant 0 : i32
    %c0_i32_2 = arith.constant 0 : i32
    return %c0_i32, %c0_i32_0, %c0_i32_1 : i32, i32, i32
  }
  func.func @transform_13(%arg0: i32) -> (i32, i32, i32) {
    %c0_i32 = arith.constant 0 : i32
    %c0_i32_0 = arith.constant 0 : i32
    %c0_i32_1 = arith.constant 0 : i32
    %c0_i32_2 = arith.constant 0 : i32
    return %c0_i32, %c0_i32_0, %c0_i32_1 : i32, i32, i32
  }
  func.func @transform_14(%arg0: i32) -> (i32, i32, i32) {
    %c0_i32 = arith.constant 0 : i32
    %c0_i32_0 = arith.constant 0 : i32
    %c0_i32_1 = arith.constant 0 : i32
    %c0_i32_2 = arith.constant 0 : i32
    return %c0_i32, %c0_i32_0, %c0_i32_1 : i32, i32, i32
  }
  func.func @transform_15(%arg0: i32) -> (i32, i32) {
    %c0_i32 = arith.constant 0 : i32
    %c0_i32_0 = arith.constant 0 : i32
    %c0_i32_1 = arith.constant 0 : i32
    return %c0_i32, %c0_i32_0 : i32, i32
  }
  func.func @transform_16(%arg0: i32) -> (i32, i32) {
    %c0_i32 = arith.constant 0 : i32
    %c0_i32_0 = arith.constant 0 : i32
    %c0_i32_1 = arith.constant 0 : i32
    return %c0_i32, %c0_i32_0 : i32, i32
  }
  func.func @transform_17(%arg0: i32) -> (i32, i32) {
    %c0_i32 = arith.constant 0 : i32
    %c0_i32_0 = arith.constant 0 : i32
    %c0_i32_1 = arith.constant 0 : i32
    return %c0_i32, %c0_i32_0 : i32, i32
  }
  func.func @transform_18(%arg0: i32) -> (i32, i32) {
    %c0_i32 = arith.constant 0 : i32
    %c0_i32_0 = arith.constant 0 : i32
    %c0_i32_1 = arith.constant 0 : i32
    return %c0_i32, %c0_i32_0 : i32, i32
  }
  func.func @transform_19(%arg0: i32) -> (i32, i32) {
    %c0_i32 = arith.constant 0 : i32
    %c0_i32_0 = arith.constant 0 : i32
    %c0_i32_1 = arith.constant 0 : i32
    return %c0_i32, %c0_i32_0 : i32, i32
  }
  func.func @transform_20(%arg0: i32) -> (i32, i32) {
    %c0_i32 = arith.constant 0 : i32
    %c0_i32_0 = arith.constant 0 : i32
    %c0_i32_1 = arith.constant 0 : i32
    return %c0_i32, %c0_i32_0 : i32, i32
  }
  func.func @transform_21(%arg0: i32) -> (i32, i32) {
    %c0_i32 = arith.constant 0 : i32
    %c0_i32_0 = arith.constant 0 : i32
    %c0_i32_1 = arith.constant 0 : i32
    return %c0_i32, %c0_i32_0 : i32, i32
  }
}

</mosaic_0001>

<bundles_post_ra>
// kernel: bert_forward.1
= control target key start
LH: loop header
LB: loop body
LE: loop exit
PB: predicated region body
PF: predicated region fallthrough
CT: control target
= control target key end

     0   :  { %s1897_s0 = inlined_call_operand.vmem [shape: f32[16,32], index: 0, kind: input, shape index: {}]   ;;  %s1898_s1 = inlined_call_operand.vmem [shape: f32[1,32], index: 1, kind: input, shape index: {}]   ;;  %s1899_s2 = inlined_call_operand.vmem [shape: f32[1,32], index: 2, kind: input, shape index: {}]   ;;  %s1900_s3 = inlined_call_operand.vmem [shape: f32[2,32,96], index: 3, kind: input, shape index: {}]   ;;  %s1901_s4 = inlined_call_operand.vmem [shape: f32[2,1,96], index: 4, kind: input, shape index: {}]   ;;  %s1902_s5 = inlined_call_operand.vmem [shape: f32[2,32,32], index: 5, kind: input, shape index: {}]   ;;  %s1903_s6 = inlined_call_operand.vmem [shape: f32[2,1,32], index: 6, kind: input, shape index: {}]   ;;  %s1904_s7 = inlined_call_operand.vmem [shape: f32[2,1,32], index: 7, kind: input, shape index: {}]   ;;  %s1905_s8 = inlined_call_operand.vmem [shape: f32[2,1,32], index: 8, kind: input, shape index: {}]   ;;  %s1906_s9 = inlined_call_operand.vmem [shape: f32[2,32,64], index: 9, kind: input, shape index: {}]   ;;  %s1907_s10 = inlined_call_operand.vmem [shape: f32[2,1,64], index: 10, kind: input, shape index: {}]   ;;  %s1908_s11 = inlined_call_operand.vmem [shape: f32[2,64,32], index: 11, kind: input, shape index: {}]   ;;  %s1909_s12 = inlined_call_operand.vmem [shape: f32[2,1,32], index: 12, kind: input, shape index: {}]   ;;  %s1910_s13 = inlined_call_operand.vmem [shape: f32[2,1,32], index: 13, kind: input, shape index: {}]   ;;  %s1911_s14 = inlined_call_operand.vmem [shape: f32[2,1,32], index: 14, kind: input, shape index: {}]   ;;  %s1912_s15 = inlined_call_operand.vmem [shape: f32[32,32], index: 15, kind: input, shape index: {}]   ;;  %s1913_s16 = inlined_call_operand.vmem [shape: f32[1,32], index: 16, kind: input, shape index: {}]   ;;  %s1914_s17 = inlined_call_operand.vmem [shape: f32[1,32], index: 17, kind: input, shape index: {}]   ;;  %s1915_s18 = inlined_call_operand.<no memory space> [shape: f32[1,1], index: 18, kind: input, shape index: {}]   ;;  %s1916_s19 = inlined_call_operand.vmem [shape: f32[2,1], index: 19, kind: input, shape index: {}]   ;;  %s1917_s20 = inlined_call_operand.vmem [shape: f32[2,1], index: 20, kind: output, shape index: {0}]   ;;  %s1918_s21 = inlined_call_operand.hbm [shape: f32[1,1], index: 21, kind: output, shape index: {1}]  }
   0x1   :  { %1928 = sst [smem:[#allocation6_spill]] %s1897_s0  ;;  %v27_v0 = vstv %s1915_s18 }
   0x2   :  { %1929 = sst [smem:[#allocation7_spill]] %s1898_s1  ;;  %28 = vst [vmem:[#allocation2] sm:$0x1] %v27_v0 }
   0x3   :  { %1930 = sst [smem:[#allocation8_spill]] %s1899_s2 }
   0x4   :  { %1931 = sst [smem:[#allocation9_spill]] %s1900_s3 }
   0x5   :  { %1932 = sst [smem:[#allocation10_spill]] %s1901_s4 }
   0x6   :  { %1933 = sst [smem:[#allocation11_spill]] %s1902_s5 }
   0x7   :  { %s1934_s3 = sld [smem:[#allocation6_spill]]  ;;  %vm75_vm0 = vcmask 261120  }
   0xd   :  { %v71_v1 = vld [vmem:[%s1934_s3] sm:$0xff]  ;;  %v72_v2 = vld [vmem:[%s1934_s3 + $0x8] sm:$0xff] }
   0xe   :  { %v76_v3 = vsel %vm75_vm0, %v71_v1, 0.0  ;;  %v79_v4 = vsel %vm75_vm0, %v72_v2, 0.0 }
   0xf   :  { %77 = vadd.xlane.f32.xlu0 %v76_v3 }
  0x10   :  { %29 = vsyncpa [#allocation4], 0  ;;  %v1406_v5 = vmov 32.0   ;;  %s1935_s4 = sld [smem:[#allocation9_spill]]  ;;  %s1407_s30 = smov 80   ;;  %vm172_vm8 = vcmask 130048  }
  0x11   :  { %1326 = vrcp.f32 %v1406_v5  ;;  %s1936_s26 = sld [smem:[#allocation7_spill]]  ;;  %s1408_s5 = smov 96   ;;  %vm216_vm9 = vcmask 64512   ;;  %vm246_vm10 = vcmask 1043456  }
  0x12   :  { %s1937_s28 = sld [smem:[#allocation8_spill]]  ;;  %s1409_s22 = smov 112  }
  0x13   :  { %s1938_s0 = sld [smem:[#allocation10_spill]]  ;;  %s1926_s23 = smov 64  }
  0x14   :  { %s1924_s1 = smov 48   ;;  %s1939_s25 = sld [smem:[#allocation11_spill]] }
  0x15   :  { %s1923_s3 = smov 16   ;;  %s1942_s27 = smov 16  }
  0x16   :  { %v139_v22 = vld [vmem:[%s1935_s4 + $0x10] sm:$0xff]  ;;  %v140_v23 = vld [vmem:[%s1935_s4 + $0x18] sm:$0xff]  ;;  %v137_v25 = vld [vmem:[%s1935_s4] sm:$0xff] }
  0x17   :  { %80 = vadd.xlane.f32.xlu0 %v79_v4  ;;  %v1327_v6 = vpop.eup %1326  ;;  %v143_v24 = vpack.c.bf16 %v140_v23, %v139_v22  ;;  %v138_v26 = vld [vmem:[%s1935_s4 + $0x8] sm:$0xff]  ;;  %v1305_v47 = vld [vmem:[%s1936_s26] ss:$0 sm:$0xff] }
  0x18   :  { %v83_v7 = vmul.f32 32.0, %v1327_v6  ;;  %vm87_vm1 = vweird.f32 %v1327_v6  ;;  %v142_v28 = vpack.c.bf16 %v138_v26, %v137_v25  ;;  %v1306_v52 = vld [vmem:[%s1937_s28] ss:$0 sm:$0xff] }
  0x19   :  { %157 = vmatpush.bf16.msra.mxu0 %v143_v24  ;;  %v1307_v57 = vld [vmem:[%s1938_s0] ss:$0 sm:$0xff] }
  0x1a   :  { %v84_v8 = vsub.f32 1.0, %v83_v7 }
  0x1c   :  { %v85_v9 = vmul.f32 %v1327_v6, %v84_v8 }
  0x1d   :  { %158 = vmatpush.bf16.msra.mxu0 %v142_v28 }
  0x1e   :  { %v86_v10 = vadd.f32 %v1327_v6, %v85_v9 }
  0x20   :  { %v1536_v11 = vsel %vm87_vm1, %v1327_v6, %v86_v10 }
  0x82   :  { %v78_v12 = vpop.xlane.xlu0 %77 }
  0x83   :  { %v89_v13 = vmul.f32 %v1536_v11, %v78_v12 }
  0x85   :  { %v91_v14 = vsub.f32 %v71_v1, %v89_v13 }
  0x87   :  { %v93_v15 = vmul.f32 %v91_v14, %v91_v14 }
  0x89   :  { %v95_v16 = vsel %vm75_vm0, %v93_v15, 0.0 }
  0x8a   :  { %96 = vadd.xlane.f32.xlu1 %v95_v16  ;;  %v81_v17 = vpop.xlane.xlu0 %80 }
  0x8b   :  { %v90_v18 = vmul.f32 %v1536_v11, %v81_v17 }
  0x8d   :  { %v92_v19 = vsub.f32 %v72_v2, %v90_v18 }
  0x8f   :  { %v94_v20 = vmul.f32 %v92_v19, %v92_v19 }
  0x91   :  { %v98_v21 = vsel %vm75_vm0, %v94_v20, 0.0 }
  0x92   :  { %99 = vadd.xlane.f32.xlu1 %v98_v21 }
  0xfd   :  { %v97_v27 = vpop.xlane.xlu1 %96 }
  0xfe   :  { %v101_v29 = vmul.f32 %v97_v27, %v1536_v11 }
 0x100   :  { %v103_v30 = vadd.f32 1e-12, %v101_v29 }
 0x102   :  { %1328 = vrsqrt.f32 %v103_v30  ;;  %vm111_vm3 = vweird.f32 %v103_v30 }
 0x105   :  { %v100_v31 = vpop.xlane.xlu1 %99 }
 0x106   :  { %v102_v32 = vmul.f32 %v100_v31, %v1536_v11 }
 0x108   :  { %v1329_v33 = vpop.eup %1328  ;;  %v104_v34 = vadd.f32 1e-12, %v102_v32 }
 0x109   :  { %v106_v35 = vmul.f32 %v1329_v33, %v103_v30  ;;  %vm112_vm2 = vweird.f32 %v1329_v33 }
 0x10a   :  { %1330 = vrsqrt.f32 %v104_v34  ;;  %vm113_vm4 = vmor %vm111_vm3, %vm112_vm2  ;;  %vm121_vm6 = vweird.f32 %v104_v34  ;;  %vm555_vm2 = vcmask 523264  }
 0x10b   :  { %v107_v36 = vmul.f32 %v1329_v33, %v106_v35 }
 0x10d   :  { %v108_v37 = vmul.f32 0.5, %v107_v36 }
 0x10f   :  { %v109_v38 = vsub.f32 1.5, %v108_v37 }
 0x110   :  { %v1331_v39 = vpop.eup %1330 }
 0x111   :  { %v110_v40 = vmul.f32 %v1329_v33, %v109_v38  ;;  %v116_v41 = vmul.f32 %v1331_v39, %v104_v34  ;;  %vm122_vm5 = vweird.f32 %v1331_v39 }
 0x112   :  { %vm123_vm7 = vmor %vm121_vm6, %vm122_vm5 }
 0x113   :  { %v117_v42 = vmul.f32 %v1331_v39, %v116_v41  ;;  %v114_v43 = vsel %vm113_vm4, %v1329_v33, %v110_v40 }
 0x114   :  { %v125_v46 = vmul.f32 %v114_v43, %v91_v14 }
 0x115   :  { %v118_v44 = vmul.f32 0.5, %v117_v42 }
 0x116   :  { %v130_v51 = vmul.f32 %v1305_v47, %v125_v46 }
 0x117   :  { %v119_v45 = vsub.f32 1.5, %v118_v44 }
 0x118   :  { %v1562_v54 = vadd.f32 %v1306_v52, %v130_v51 }
 0x119   :  { %v120_v48 = vmul.f32 %v1331_v39, %v119_v45 }
 0x11b   :  { %v124_v49 = vsel %vm123_vm7, %v1331_v39, %v120_v48 }
 0x11c   :  { %v126_v50 = vmul.f32 %v124_v49, %v92_v19 }
 0x11e   :  { %v131_v53 = vmul.f32 %v1305_v47, %v126_v50 }
 0x120   :  { %v1564_v55 = vadd.f32 %v1306_v52, %v131_v53 }
 0x122   :  { %v141_v56 = vpack.c.bf16 %v1564_v55, %v1562_v54 }
 0x124   :  { %1229 = vmatmul.msk.bf16.vlgmr.msra.gmra.mxu0 %vm75_vm0, %v141_v56 }
 0x1a1   :  { %v160_v58 = vpop.f32.mrf.mxu0 }
 0x1a2   :  { %v161_v59 = vadd.f32 %v1307_v57, %v160_v58 }
 0x1a4   :  { %v165_v60 = vpack.c.bf16 %v161_v59, %v161_v59 }
 0x1a6   :  { %v168_v61 = vunpack.c.l.b16 %v165_v60 }
 0x1a8   :  { %v169_v62 = vpack.c.b16 %v168_v61, %v168_v61 }
 0x1a9   :  { %v162_v63 = vpop.f32.mrf.mxu0 }
 0x1aa   :  { %v163_v0 = vadd.f32 %v1307_v57, %v162_v63  ;;  %286 = vrot.lane.b32.xlu0 %v169_v62, %s1407_s30  ;;  %170 = vrot.lane.b32.xlu2 %v169_v62, %s1408_s5 }
 0x1ac   :  { %v166_v1 = vpack.c.bf16 %v163_v0, %v163_v0 }
 0x1ae   :  { %v193_v2 = vunpack.c.l.b16 %v166_v1 }
 0x1b0   :  { %v1574_v3 = vpack.c.b16 %v193_v2, %v193_v2 }
 0x1b2   :  { %309 = vrot.lane.b32.xlu1 %v1574_v3, %s1407_s30  ;;  %195 = vrot.lane.b32.xlu2 %v1574_v3, %s1408_s5 }
 0x1ba   :  { %284 = vrot.lane.b32.xlu2 %v169_v62, %s1409_s22 }
 0x1c2   :  { %307 = vrot.lane.b32.xlu2 %v1574_v3, %s1409_s22 }
 0x204   :  { %v171_v4 = vpop.permute.xlu2 %170 }
 0x205   :  { %v177_v5 = vsel %vm172_vm8, %v171_v4, 0 }
 0x206   :  { %186 = vmatpush.bf16.xpose.msra.mxu1 %v177_v5 }
 0x20c   :  { %v196_v6 = vpop.permute.xlu2 %195 }
 0x20d   :  { %1230 = vmatmul.msk.bf16.vlgmr.msra.gmra.mxu1 %vm172_vm8, %v165_v60  ;;  %v201_v7 = vsel %vm172_vm8, %v196_v6, 0 }
 0x20e   :  { %210 = vmatpush.bf16.xpose.msra.mxu2 %v201_v7 }
 0x214   :  { %v285_v10 = vpop.permute.xlu2 %284 }
 0x215   :  { %1231 = vmatmul.msk.bf16.vlgmr.msra.gmra.mxu2 %vm172_vm8, %v166_v1 }
 0x21c   :  { %v287_v8 = vpop.permute.xlu0 %286  ;;  %v308_v14 = vpop.permute.xlu2 %307 }
 0x21d   :  { %v292_v9 = vsel %vm172_vm8, %v287_v8, 0 }
 0x21e   :  { %301 = vmatpush.bf16.xpose.msrb.mxu0 %v292_v9 }
 0x224   :  { %v310_v12 = vpop.permute.xlu1 %309 }
 0x225   :  { %1234 = vmatmul.msk.bf16.vlgmr.msrb.gmra.mxu0 %vm172_vm8, %v285_v10  ;;  %v315_v13 = vsel %vm172_vm8, %v310_v12, 0  ;;  %v408_v12 = vld [vmem:[%s1939_s25 + $0x10] sm:$0xff] }
 0x226   :  { %324 = vmatpush.bf16.xpose.msrb.mxu1 %v315_v13  ;;  %v409_v13 = vld [vmem:[%s1939_s25 + $0x18] sm:$0xff] }
 0x22d   :  { %1235 = vmatmul.msk.bf16.vlgmr.msrb.gmra.mxu1 %vm172_vm8, %v308_v14  ;;  %v412_v14 = vpack.c.bf16 %v409_v13, %v408_v12 }
 0x22f   :  { %426 = vmatpush.bf16.msra.mxu0 %v412_v14 }
 0x28a   :  { %v188_v15 = vpop.f32.mrf.mxu1 }
 0x28b   :  { %v217_v16 = vsel %vm216_vm9, %v188_v15, -inf }
 0x28c   :  { %218 = vmax.xlane.f32.xlu2 %v217_v16 }
 0x292   :  { %v190_v17 = vpop.f32.mrf.mxu1 }
 0x298   :  { %v212_v18 = vpop.f32.mrf.mxu2 }
 0x299   :  { %v220_v19 = vsel %vm216_vm9, %v212_v18, -inf }
 0x29a   :  { %221 = vmax.xlane.f32.xlu0 %v220_v19 }
 0x2a0   :  { %v214_v20 = vpop.f32.mrf.mxu2 }
 0x2a2   :  { %v303_v21 = vpop.f32.mrf.mxu0 }
 0x2a3   :  { %v330_v22 = vsel %vm216_vm9, %v303_v21, -inf }
 0x2a4   :  { %331 = vmax.xlane.f32.xlu1 %v330_v22  ;;  %v406_v22 = vld [vmem:[%s1939_s25] sm:$0xff] }
 0x2aa   :  { %v305_v23 = vpop.f32.mrf.mxu0  ;;  %v326_v24 = vpop.f32.mrf.mxu1 }
 0x2ab   :  { %v333_v25 = vsel %vm216_vm9, %v326_v24, -inf  ;;  %v407_v23 = vld [vmem:[%s1939_s25 + $0x8] sm:$0xff] }
 0x2ac   :  { %334 = vmax.xlane.f32.xlu2 %v333_v25 }
 0x2ae   :  { %263 = vrot.lane.b32.xlu0 %v1574_v3, %s1926_s23 }
 0x2b2   :  { %v328_v26 = vpop.f32.mrf.mxu1 }
 0x2c4   :  { %241 = vrot.lane.b32.xlu2 %v169_v62, %s1926_s23 }
 0x2cc   :  { %354 = vrot.lane.b32.xlu2 %v169_v62, %s1924_s1 }
 0x2ff   :  { %v219_v27 = vpop.xlane.xlu2 %218 }
 0x300   :  { %v223_v28 = vsub.f32 %v188_v15, %v219_v27 }
 0x302   :  { %v225_v29 = vmul.f32 1.442695, %v223_v28 }
 0x304   :  { %1332 = vpow2.f32 %v225_v29 }
 0x30a   :  { %v1333_v30 = vpop.eup %1332 }
 0x30b   :  { %v229_v31 = vsel %vm216_vm9, %v1333_v30, 0.0 }
 0x30c   :  { %230 = vadd.xlane.f32.xlu0 %v229_v31  ;;  %v1308_v31 = vld [vmem:[%s1903_s6] ss:$0 sm:$0xff] }
 0x30d   :  { %v222_v32 = vpop.xlane.xlu0 %221 }
 0x30e   :  { %v224_v33 = vsub.f32 %v212_v18, %v222_v32 }
 0x310   :  { %v227_v34 = vmul.f32 1.442695, %v224_v33 }
 0x312   :  { %1334 = vpow2.f32 %v227_v34 }
 0x317   :  { %v332_v35 = vpop.xlane.xlu1 %331 }
 0x318   :  { %v1335_v36 = vpop.eup %1334  ;;  %v336_v37 = vsub.f32 %v303_v21, %v332_v35 }
 0x319   :  { %v232_v38 = vsel %vm216_vm9, %v1335_v36, 0.0 }
 0x31a   :  { %v338_v39 = vmul.f32 1.442695, %v336_v37  ;;  %233 = vadd.xlane.f32.xlu1 %v232_v38 }
 0x31c   :  { %1336 = vpow2.f32 %v338_v39 }
 0x31f   :  { %v335_v40 = vpop.xlane.xlu2 %334 }
 0x320   :  { %v337_v41 = vsub.f32 %v326_v24, %v335_v40  ;;  %375 = vrot.lane.b32.xlu0 %v1574_v3, %s1924_s1  ;;  %v264_v45 = vpop.permute.xlu0 %263  ;;  %v411_v24 = vpack.c.bf16 %v407_v23, %v406_v22  ;;  %v544_v22 = vld [vmem:[%s1908_s11 + $0x30] sm:$0xff]  ;;  %v545_v23 = vld [vmem:[%s1908_s11 + $0x38] sm:$0xff] }
 0x321   :  { %v269_v48 = vsel %vm246_vm10, %v264_v45, 0 }
 0x322   :  { %v1337_v42 = vpop.eup %1336  ;;  %v340_v43 = vmul.f32 1.442695, %v337_v41  ;;  %427 = vmatpush.bf16.msra.mxu0 %v411_v24  ;;  %v550_v24 = vpack.c.bf16 %v545_v23, %v544_v22 }
 0x323   :  { %v342_v44 = vsel %vm216_vm9, %v1337_v42, 0.0 }
 0x324   :  { %1338 = vpow2.f32 %v340_v43  ;;  %343 = vadd.xlane.f32.xlu1 %v342_v44 }
 0x327   :  { %v242_v46 = vpop.permute.xlu2 %241 }
 0x328   :  { %v248_v47 = vsel %vm246_vm10, %v242_v46, 0 }
 0x329   :  { %257 = vmatpush.bf16.msra.mxu3 %v248_v47 }
 0x32a   :  { %v1339_v49 = vpop.eup %1338 }
 0x32b   :  { %v345_v50 = vsel %vm216_vm9, %v1339_v49, 0.0 }
 0x32c   :  { %346 = vadd.xlane.f32.xlu1 %v345_v50 }
 0x32d   :  { %278 = vmatpush.bf16.msrb.mxu3 %v269_v48 }
 0x32f   :  { %v355_v51 = vpop.permute.xlu2 %354 }
 0x330   :  { %v360_v52 = vsel %vm246_vm10, %v355_v51, 0 }
 0x331   :  { %369 = vmatpush.bf16.msrb.mxu2 %v360_v52 }
 0x335   :  { %563 = vmatpush.bf16.msra.mxu2 %v550_v24 }
 0x37f   :  { %v231_v53 = vpop.xlane.xlu0 %230 }
 0x380   :  { %1340 = vrcp.f32 %v231_v53  ;;  %v492_v53 = vld [vmem:[%s1906_s9] sm:$0xff] }
 0x386   :  { %v1341_v56 = vpop.eup %1340 }
 0x387   :  { %v237_v57 = vmul.f32 %v1341_v56, %v1333_v30  ;;  %v493_v56 = vld [vmem:[%s1906_s9 + $0x8] sm:$0xff] }
 0x389   :  { %v239_v58 = vpack.c.bf16 %v237_v57, %v237_v57  ;;  %v497_v57 = vpack.c.bf16 %v493_v56, %v492_v53 }
 0x38b   :  { %1232 = vmatmul.msk.bf16.vlgmr.msra.gmra.mxu3 %vm216_vm9, %v239_v58 }
 0x38d   :  { %v234_v59 = vpop.xlane.xlu1 %233 }
 0x38e   :  { %1342 = vrcp.f32 %v234_v59 }
 0x392   :  { %v376_v60 = vpop.permute.xlu0 %375 }
 0x393   :  { %v381_v61 = vsel %vm246_vm10, %v376_v60, 0 }
 0x394   :  { %v1343_v62 = vpop.eup %1342  ;;  %390 = vmatpush.bf16.msra.mxu3 %v381_v61 }
 0x395   :  { %v238_v63 = vmul.f32 %v1343_v62, %v1335_v36 }
 0x397   :  { %v344_v0 = vpop.xlane.xlu1 %343  ;;  %v240_v1 = vpack.c.bf16 %v238_v63, %v238_v63 }
 0x398   :  { %1344 = vrcp.f32 %v344_v0 }
 0x39b   :  { %1233 = vmatmul.msk.bf16.vlgmr.msrb.gmra.mxu3 %vm216_vm9, %v240_v1 }
 0x39e   :  { %v1345_v2 = vpop.eup %1344 }
 0x39f   :  { %v350_v3 = vmul.f32 %v1345_v2, %v1337_v42  ;;  %v347_v4 = vpop.xlane.xlu1 %346 }
 0x3a0   :  { %1346 = vrcp.f32 %v347_v4 }
 0x3a1   :  { %v352_v5 = vpack.c.bf16 %v350_v3, %v350_v3 }
 0x3a3   :  { %1236 = vmatmul.msk.bf16.vlgmr.msrb.gmra.mxu2 %vm216_vm9, %v352_v5 }
 0x3a6   :  { %v1347_v6 = vpop.eup %1346 }
 0x3a7   :  { %v351_v7 = vmul.f32 %v1347_v6, %v1339_v49  ;;  %v495_v49 = vld [vmem:[%s1906_s9 + $0x18] sm:$0xff] }
 0x3a9   :  { %v353_v8 = vpack.c.bf16 %v351_v7, %v351_v7 }
 0x3ab   :  { %1237 = vmatmul.msk.bf16.vlgmr.msra.gmra.mxu3 %vm216_vm9, %v353_v8 }
 0x40e   :  { %v259_v9 = vpop.f32.mrf.mxu3 }
 0x416   :  { %v261_v10 = vpop.f32.mrf.mxu3 }
 0x417   :  { %v1309_v10 = vld [vmem:[%s1904_s7] ss:$0 sm:$0xff] }
 0x41e   :  { %v280_v15 = vpop.f32.mrf.mxu3 }
 0x426   :  { %v282_v16 = vpop.f32.mrf.mxu3  ;;  %v371_v17 = vpop.f32.mrf.mxu2 }
 0x42e   :  { %v373_v18 = vpop.f32.mrf.mxu2  ;;  %v392_v19 = vpop.f32.mrf.mxu3 }
 0x42f   :  { %v1295_v20 = vpack.i.bf16 %v392_v19, %v371_v17 }
 0x431   :  { %1296 = vrot.lane.b32.xlu1 %v1295_v20, %s1923_s3 }
 0x436   :  { %v394_v21 = vpop.f32.mrf.mxu3 }
 0x4a3   :  { %v1297_v25 = vpop.permute.xlu1 %1296 }
 0x4a4   :  { %v1299_v26 = vunpack.i.h.bf16 %v1297_v25  ;;  %v1298_v27 = vunpack.i.l.bf16 %v1297_v25  ;;  %v542_v25 = vld [vmem:[%s1908_s11 + $0x20] sm:$0xff] }
 0x4a6   :  { %v405_v28 = vsel %vm172_vm8, %v280_v15, %v1299_v26  ;;  %v404_v29 = vsel %vm172_vm8, %v259_v9, %v1298_v27  ;;  %v1310_v15 = vld [vmem:[%s1905_s8] ss:$0 sm:$0xff]  ;;  %v543_v26 = vld [vmem:[%s1908_s11 + $0x28] sm:$0xff] }
 0x4a7   :  { %v410_v30 = vpack.c.bf16 %v405_v28, %v404_v29  ;;  %v549_v27 = vpack.c.bf16 %v543_v26, %v542_v25  ;;  %v540_v28 = vld [vmem:[%s1908_s11 + $0x10] sm:$0xff]  ;;  %v541_v29 = vld [vmem:[%s1908_s11 + $0x18] sm:$0xff] }
 0x4a9   :  { %1238 = vmatmul.msk.bf16.vlgmr.msra.gmra.mxu0 %vm75_vm0, %v410_v30  ;;  %564 = vmatpush.bf16.msra.mxu2 %v549_v27  ;;  %v548_v30 = vpack.c.bf16 %v541_v29, %v540_v28 }
 0x4ad   :  { %565 = vmatpush.bf16.msra.mxu2 %v548_v30 }
 0x526   :  { %v429_v32 = vpop.f32.mrf.mxu0 }
 0x527   :  { %v430_v33 = vadd.f32 %v1308_v31, %v429_v32  ;;  %v538_v32 = vld [vmem:[%s1908_s11] sm:$0xff] }
 0x529   :  { %v434_v34 = vadd.f32 %v430_v33, %v1562_v54  ;;  %v539_v33 = vld [vmem:[%s1908_s11 + $0x8] sm:$0xff] }
 0x52b   :  { %v438_v35 = vsel %vm75_vm0, %v434_v34, 0.0 }
 0x52c   :  { %439 = vadd.xlane.f32.xlu2 %v438_v35 }
 0x52e   :  { %v431_v36 = vpop.f32.mrf.mxu0 }
 0x52f   :  { %v432_v37 = vadd.f32 %v1308_v31, %v431_v36  ;;  %v1311_v31 = vld [vmem:[%s1907_s10] ss:$0 sm:$0xff] }
 0x531   :  { %v435_v38 = vadd.f32 %v432_v37, %v1564_v55  ;;  %v494_v55 = vld [vmem:[%s1906_s9 + $0x10] sm:$0xff] }
 0x532   :  { %v498_v50 = vpack.c.bf16 %v495_v49, %v494_v55 }
 0x533   :  { %v441_v39 = vsel %vm75_vm0, %v435_v38, 0.0 }
 0x534   :  { %442 = vadd.xlane.f32.xlu0 %v441_v39  ;;  %512 = vmatpush.bf16.msra.mxu1 %v498_v50 }
 0x538   :  { %513 = vmatpush.bf16.msra.mxu1 %v497_v57 }
 0x59f   :  { %v440_v40 = vpop.xlane.xlu2 %439 }
 0x5a0   :  { %v444_v41 = vmul.f32 %v440_v40, %v1536_v11 }
 0x5a2   :  { %v446_v42 = vsub.f32 %v434_v34, %v444_v41  ;;  %v547_v34 = vpack.c.bf16 %v539_v33, %v538_v32 }
 0x5a4   :  { %v448_v43 = vmul.f32 %v446_v42, %v446_v42  ;;  %566 = vmatpush.bf16.msra.mxu2 %v547_v34 }
 0x5a6   :  { %v450_v44 = vsel %vm75_vm0, %v448_v43, 0.0 }
 0x5a7   :  { %v443_v45 = vpop.xlane.xlu0 %442  ;;  %451 = vadd.xlane.f32.xlu1 %v450_v44 }
 0x5a8   :  { %v445_v54 = vmul.f32 %v443_v45, %v1536_v11 }
 0x5aa   :  { %v447_v46 = vsub.f32 %v435_v38, %v445_v54 }
 0x5ac   :  { %v449_v47 = vmul.f32 %v447_v46, %v447_v46 }
 0x5ae   :  { %v453_v48 = vsel %vm75_vm0, %v449_v47, 0.0 }
 0x5af   :  { %454 = vadd.xlane.f32.xlu2 %v453_v48 }
 0x61a   :  { %v452_v51 = vpop.xlane.xlu1 %451 }
 0x61b   :  { %v456_v52 = vmul.f32 %v452_v51, %v1536_v11 }
 0x61d   :  { %v458_v58 = vadd.f32 1e-12, %v456_v52 }
 0x61f   :  { %1348 = vrsqrt.f32 %v458_v58  ;;  %vm466_vm12 = vweird.f32 %v458_v58 }
 0x622   :  { %v455_v59 = vpop.xlane.xlu2 %454 }
 0x623   :  { %v457_v60 = vmul.f32 %v455_v59, %v1536_v11 }
 0x625   :  { %v1349_v61 = vpop.eup %1348  ;;  %v459_v62 = vadd.f32 1e-12, %v457_v60 }
 0x626   :  { %v461_v63 = vmul.f32 %v1349_v61, %v458_v58  ;;  %vm467_vm11 = vweird.f32 %v1349_v61  ;;  %v1312_v58 = vld [vmem:[%s1909_s12] ss:$0 sm:$0xff] }
 0x627   :  { %1350 = vrsqrt.f32 %v459_v62  ;;  %vm468_vm13 = vmor %vm466_vm12, %vm467_vm11  ;;  %vm476_vm15 = vweird.f32 %v459_v62 }
 0x628   :  { %v462_v0 = vmul.f32 %v1349_v61, %v461_v63 }
 0x62a   :  { %v463_v1 = vmul.f32 0.5, %v462_v0 }
 0x62c   :  { %v464_v2 = vsub.f32 1.5, %v463_v1 }
 0x62d   :  { %v1351_v3 = vpop.eup %1350 }
 0x62e   :  { %v465_v4 = vmul.f32 %v1349_v61, %v464_v2  ;;  %v471_v5 = vmul.f32 %v1351_v3, %v459_v62  ;;  %vm477_vm14 = vweird.f32 %v1351_v3 }
 0x62f   :  { %vm478_vm1 = vmor %vm476_vm15, %vm477_vm14 }
 0x630   :  { %v472_v6 = vmul.f32 %v1351_v3, %v471_v5  ;;  %v469_v7 = vsel %vm468_vm13, %v1349_v61, %v465_v4 }
 0x631   :  { %v480_v12 = vmul.f32 %v469_v7, %v446_v42 }
 0x632   :  { %v473_v8 = vmul.f32 0.5, %v472_v6 }
 0x633   :  { %v485_v16 = vmul.f32 %v1309_v10, %v480_v12 }
 0x634   :  { %v474_v9 = vsub.f32 1.5, %v473_v8 }
 0x635   :  { %v490_v19 = vadd.f32 %v1310_v15, %v485_v16 }
 0x636   :  { %v475_v13 = vmul.f32 %v1351_v3, %v474_v9 }
 0x638   :  { %v479_v14 = vsel %vm478_vm1, %v1351_v3, %v475_v13 }
 0x639   :  { %v481_v17 = vmul.f32 %v479_v14, %v447_v46  ;;  %v1243_v14 = vld [vmem:[%s1935_s4 + $0x30] sm:$0xff] }
 0x63b   :  { %v486_v18 = vmul.f32 %v1309_v10, %v481_v17 }
 0x63d   :  { %v491_v20 = vadd.f32 %v1310_v15, %v486_v18  ;;  %v1244_v15 = vld [vmem:[%s1935_s4 + $0x38] sm:$0xff] }
 0x63e   :  { %v638_v16 = vpack.c.bf16 %v1244_v15, %v1243_v14 }
 0x63f   :  { %v496_v21 = vpack.c.bf16 %v491_v20, %v490_v19 }
 0x640   :  { %653 = vmatpush.bf16.msrb.mxu3 %v638_v16 }
 0x641   :  { %1239 = vmatmul.msk.bf16.vlgmr.msra.gmra.mxu1 %vm75_vm0, %v496_v21 }
 0x6be   :  { %v515_v35 = vpop.f32.mrf.mxu1 }
 0x6bf   :  { %v516_v36 = vadd.f32 %v1311_v31, %v515_v35 }
 0x6c1   :  { %v520_v37 = vmul.f32 %v516_v36, %v516_v36 }
 0x6c3   :  { %v522_v38 = vmul.f32 %v520_v37, %v516_v36 }
 0x6c5   :  { %v524_v39 = vmul.f32 0.044715, %v522_v38  ;;  %v1313_v38 = vld [vmem:[%s1910_s13] ss:$0 sm:$0xff] }
 0x6c6   :  { %v517_v40 = vpop.f32.mrf.mxu1 }
 0x6c7   :  { %v526_v41 = vadd.f32 %v524_v39, %v516_v36  ;;  %v518_v42 = vadd.f32 %v1311_v31, %v517_v40 }
 0x6c9   :  { %v528_v43 = vmul.f32 0.7978846, %v526_v41  ;;  %v521_v44 = vmul.f32 %v518_v42, %v518_v42 }
 0x6cb   :  { %v523_v45 = vmul.f32 %v521_v44, %v518_v42  ;;  %1352 = vtanh.f32 %v528_v43 }
 0x6cd   :  { %v525_v54 = vmul.f32 0.044715, %v523_v45 }
 0x6cf   :  { %v527_v46 = vadd.f32 %v525_v54, %v518_v42 }
 0x6d1   :  { %v529_v47 = vmul.f32 0.7978846, %v527_v46  ;;  %v1353_v48 = vpop.eup %1352 }
 0x6d2   :  { %v532_v55 = vadd.f32 1.0, %v1353_v48  ;;  %v1315_v48 = vld [vmem:[%s1938_s0 + $0x1] ss:$0 sm:$0xff]  ;;  %s1940_s0 = smov 64  }
 0x6d3   :  { %1354 = vtanh.f32 %v529_v47 }
 0x6d4   :  { %v534_v50 = vmul.f32 0.5, %v532_v55 }
 0x6d6   :  { %v536_v53 = vmul.f32 %v534_v50, %v516_v36 }
 0x6d9   :  { %v1355_v49 = vpop.eup %1354 }
 0x6da   :  { %v533_v51 = vadd.f32 1.0, %v1355_v49 }
 0x6dc   :  { %v535_v52 = vmul.f32 0.5, %v533_v51 }
 0x6de   :  { %v537_v56 = vmul.f32 %v535_v52, %v518_v42  ;;  %v1314_v42 = vld [vmem:[%s1911_s14] ss:$0 sm:$0xff] }
 0x6e0   :  { %v546_v57 = vpack.c.bf16 %v537_v56, %v536_v53 }
 0x6e2   :  { %1240 = vmatmul.msk.bf16.vlgmr.msra.gmra.mxu2 %vm555_vm2, %v546_v57 }
 0x765   :  { %v568_v59 = vpop.f32.mrf.mxu2 }
 0x766   :  { %v569_v60 = vadd.f32 %v1312_v58, %v568_v59 }
 0x768   :  { %v573_v61 = vadd.f32 %v569_v60, %v490_v19  ;;  %v1241_v19 = vld [vmem:[%s1935_s4 + $0x20] sm:$0xff] }
 0x76a   :  { %v577_v62 = vsel %vm75_vm0, %v573_v61, 0.0 }
 0x76b   :  { %578 = vadd.xlane.f32.xlu0 %v577_v62 }
 0x76d   :  { %v570_v63 = vpop.f32.mrf.mxu2 }
 0x76e   :  { %v571_v0 = vadd.f32 %v1312_v58, %v570_v63 }
 0x770   :  { %v574_v1 = vadd.f32 %v571_v0, %v491_v20  ;;  %v1242_v20 = vld [vmem:[%s1935_s4 + $0x28] sm:$0xff] }
 0x771   :  { %v637_v21 = vpack.c.bf16 %v1242_v20, %v1241_v19 }
 0x772   :  { %v580_v2 = vsel %vm75_vm0, %v574_v1, 0.0 }
 0x773   :  { %581 = vadd.xlane.f32.xlu2 %v580_v2  ;;  %654 = vmatpush.bf16.msrb.mxu3 %v637_v21 }
 0x7de   :  { %v579_v3 = vpop.xlane.xlu0 %578 }
 0x7df   :  { %v583_v4 = vmul.f32 %v579_v3, %v1536_v11 }
 0x7e1   :  { %v585_v5 = vsub.f32 %v573_v61, %v583_v4 }
 0x7e3   :  { %v587_v6 = vmul.f32 %v585_v5, %v585_v5 }
 0x7e5   :  { %v589_v7 = vsel %vm75_vm0, %v587_v6, 0.0 }
 0x7e6   :  { %v582_v8 = vpop.xlane.xlu2 %581  ;;  %590 = vadd.xlane.f32.xlu0 %v589_v7 }
 0x7e7   :  { %v584_v9 = vmul.f32 %v582_v8, %v1536_v11 }
 0x7e9   :  { %v586_v10 = vsub.f32 %v574_v1, %v584_v9 }
 0x7eb   :  { %v588_v12 = vmul.f32 %v586_v10, %v586_v10 }
 0x7ed   :  { %v592_v13 = vsel %vm75_vm0, %v588_v12, 0.0 }
 0x7ee   :  { %593 = vadd.xlane.f32.xlu2 %v592_v13 }
 0x859   :  { %v591_v17 = vpop.xlane.xlu0 %590 }
 0x85a   :  { %v595_v18 = vmul.f32 %v591_v17, %v1536_v11 }
 0x85c   :  { %v597_v22 = vadd.f32 1e-12, %v595_v18 }
 0x85e   :  { %1356 = vrsqrt.f32 %v597_v22  ;;  %vm605_vm4 = vweird.f32 %v597_v22 }
 0x861   :  { %v594_v23 = vpop.xlane.xlu2 %593 }
 0x862   :  { %v596_v24 = vmul.f32 %v594_v23, %v1536_v11 }
 0x864   :  { %v1357_v25 = vpop.eup %1356  ;;  %v598_v26 = vadd.f32 1e-12, %v596_v24 }
 0x865   :  { %v600_v27 = vmul.f32 %v1357_v25, %v597_v22  ;;  %vm606_vm3 = vweird.f32 %v1357_v25 }
 0x866   :  { %1358 = vrsqrt.f32 %v598_v26  ;;  %vm607_vm5 = vmor %vm605_vm4, %vm606_vm3  ;;  %vm615_vm7 = vweird.f32 %v598_v26 }
 0x867   :  { %v601_v28 = vmul.f32 %v1357_v25, %v600_v27 }
 0x869   :  { %v602_v29 = vmul.f32 0.5, %v601_v28 }
 0x86b   :  { %v603_v30 = vsub.f32 1.5, %v602_v29 }
 0x86c   :  { %v1359_v31 = vpop.eup %1358 }
 0x86d   :  { %v604_v32 = vmul.f32 %v1357_v25, %v603_v30  ;;  %v610_v33 = vmul.f32 %v1359_v31, %v598_v26  ;;  %vm616_vm6 = vweird.f32 %v1359_v31 }
 0x86e   :  { %vm617_vm11 = vmor %vm615_vm7, %vm616_vm6  ;;  %vm1150_vm6 = vcmask 1041409   ;;  %vm1175_vm7 = vcmask 254976  }
 0x86f   :  { %v611_v34 = vmul.f32 %v1359_v31, %v610_v33  ;;  %v608_v35 = vsel %vm607_vm5, %v1357_v25, %v604_v32 }
 0x870   :  { %v619_v39 = vmul.f32 %v608_v35, %v585_v5 }
 0x871   :  { %v612_v36 = vmul.f32 0.5, %v611_v34 }
 0x872   :  { %v624_v43 = vmul.f32 %v1313_v38, %v619_v39 }
 0x873   :  { %v613_v37 = vsub.f32 1.5, %v612_v36 }
 0x874   :  { %v1718_v54 = vadd.f32 %v1314_v42, %v624_v43 }
 0x875   :  { %v614_v40 = vmul.f32 %v1359_v31, %v613_v37 }
 0x877   :  { %v618_v41 = vsel %vm617_vm11, %v1359_v31, %v614_v40 }
 0x878   :  { %v620_v44 = vmul.f32 %v618_v41, %v586_v10 }
 0x87a   :  { %v625_v45 = vmul.f32 %v1313_v38, %v620_v44 }
 0x87c   :  { %v1720_v46 = vadd.f32 %v1314_v42, %v625_v45 }
 0x87e   :  { %v636_v47 = vpack.c.bf16 %v1720_v46, %v1718_v54 }
 0x880   :  { %1246 = vmatmul.msk.bf16.vlgmr.msrb.gmra.mxu3 %vm75_vm0, %v636_v47 }
 0x903   :  { %v656_v55 = vpop.f32.mrf.mxu3 }
 0x904   :  { %v657_v49 = vadd.f32 %v1315_v48, %v656_v55 }
 0x906   :  { %v661_v50 = vpack.c.bf16 %v657_v49, %v657_v49 }
 0x908   :  { %v664_v51 = vunpack.c.l.b16 %v661_v50 }
 0x90a   :  { %v1728_v52 = vpack.c.b16 %v664_v51, %v664_v51 }
 0x90b   :  { %v658_v53 = vpop.f32.mrf.mxu3 }
 0x90c   :  { %v659_v56 = vadd.f32 %v1315_v48, %v658_v53  ;;  %779 = vrot.lane.b32.xlu2 %v1728_v52, %s1407_s30  ;;  %666 = vrot.lane.b32.xlu0 %v1728_v52, %s1408_s5 }
 0x90e   :  { %v662_v57 = vpack.c.bf16 %v659_v56, %v659_v56 }
 0x910   :  { %v688_v58 = vunpack.c.l.b16 %v662_v57 }
 0x912   :  { %v1734_v59 = vpack.c.b16 %v688_v58, %v688_v58 }
 0x914   :  { %690 = vrot.lane.b32.xlu1 %v1734_v59, %s1408_s5  ;;  %802 = vrot.lane.b32.xlu0 %v1734_v59, %s1407_s30  ;;  %s1941_s30 = smov 48  }
 0x91c   :  { %777 = vrot.lane.b32.xlu1 %v1728_v52, %s1409_s22  ;;  %800 = vrot.lane.b32.xlu0 %v1734_v59, %s1409_s22 }
 0x966   :  { %v780_v60 = vpop.permute.xlu2 %779 }
 0x967   :  { %v785_v63 = vsel %vm172_vm8, %v780_v60, 0 }
 0x97e   :  { %v667_v61 = vpop.permute.xlu0 %666 }
 0x97f   :  { %v672_v62 = vsel %vm172_vm8, %v667_v61, 0 }
 0x980   :  { %681 = vmatpush.bf16.xpose.msrb.mxu0 %v672_v62 }
 0x986   :  { %v691_v0 = vpop.permute.xlu1 %690  ;;  %v803_v1 = vpop.permute.xlu0 %802 }
 0x987   :  { %v696_v2 = vsel %vm172_vm8, %v691_v0, 0  ;;  %v808_v3 = vsel %vm172_vm8, %v803_v1, 0  ;;  %1247 = vmatmul.msk.bf16.vlgmr.msrb.gmra.mxu0 %vm172_vm8, %v661_v50 }
 0x988   :  { %794 = vmatpush.bf16.xpose.msra.mxu0 %v785_v63  ;;  %705 = vmatpush.bf16.xpose.msrb.mxu1 %v696_v2 }
 0x98e   :  { %v778_v4 = vpop.permute.xlu1 %777  ;;  %v801_v5 = vpop.permute.xlu0 %800 }
 0x98f   :  { %1248 = vmatmul.msk.bf16.vlgmr.msrb.gmra.mxu1 %vm172_vm8, %v662_v57 }
 0x990   :  { %817 = vmatpush.bf16.xpose.msra.mxu1 %v808_v3  ;;  %v1257_v3 = vld [vmem:[%s1939_s25 + $0x30] sm:$0xff] }
 0x997   :  { %1251 = vmatmul.msk.bf16.vlgmr.msra.gmra.mxu0 %vm172_vm8, %v778_v4  ;;  %v1258_v4 = vld [vmem:[%s1939_s25 + $0x38] sm:$0xff] }
 0x99f   :  { %1252 = vmatmul.msk.bf16.vlgmr.msra.gmra.mxu1 %vm172_vm8, %v801_v5  ;;  %v906_v5 = vpack.c.bf16 %v1258_v4, %v1257_v3 }
 0x9a1   :  { %921 = vmatpush.bf16.msrb.mxu0 %v906_v5 }
 0xa04   :  { %v683_v6 = vpop.f32.mrf.mxu0 }
 0xa05   :  { %v711_v7 = vsel %vm216_vm9, %v683_v6, -inf }
 0xa06   :  { %712 = vmax.xlane.f32.xlu2 %v711_v7 }
 0xa0c   :  { %v685_v8 = vpop.f32.mrf.mxu0  ;;  %v707_v9 = vpop.f32.mrf.mxu1 }
 0xa0d   :  { %v714_v10 = vsel %vm216_vm9, %v707_v9, -inf }
 0xa0e   :  { %715 = vmax.xlane.f32.xlu1 %v714_v10 }
 0xa14   :  { %v709_v12 = vpop.f32.mrf.mxu1  ;;  %v796_v13 = vpop.f32.mrf.mxu0 }
 0xa15   :  { %v823_v14 = vsel %vm216_vm9, %v796_v13, -inf }
 0xa16   :  { %824 = vmax.xlane.f32.xlu0 %v823_v14  ;;  %v1255_v14 = vld [vmem:[%s1939_s25 + $0x20] sm:$0xff] }
 0xa1c   :  { %v798_v15 = vpop.f32.mrf.mxu0  ;;  %v819_v16 = vpop.f32.mrf.mxu1 }
 0xa1d   :  { %v826_v17 = vsel %vm216_vm9, %v819_v16, -inf  ;;  %v1256_v15 = vld [vmem:[%s1939_s25 + $0x28] sm:$0xff] }
 0xa1e   :  { %827 = vmax.xlane.f32.xlu2 %v826_v17 }
 0xa24   :  { %v821_v18 = vpop.f32.mrf.mxu1 }
 0xa36   :  { %735 = vrot.lane.b32.xlu2 %v1728_v52, %s1940_s0 }
 0xa3e   :  { %868 = vrot.lane.b32.xlu2 %v1734_v59, %s1941_s30 }
 0xa79   :  { %v713_v19 = vpop.xlane.xlu2 %712 }
 0xa7a   :  { %v717_v20 = vsub.f32 %v683_v6, %v713_v19 }
 0xa7c   :  { %v719_v21 = vmul.f32 1.442695, %v717_v20 }
 0xa7e   :  { %1360 = vpow2.f32 %v719_v21 }
 0xa81   :  { %v716_v22 = vpop.xlane.xlu1 %715 }
 0xa82   :  { %v718_v23 = vsub.f32 %v707_v9, %v716_v22 }
 0xa84   :  { %v1361_v24 = vpop.eup %1360  ;;  %v721_v25 = vmul.f32 1.442695, %v718_v23  ;;  %v1316_v23 = vld [vmem:[%s1903_s6 + $0x1] ss:$0 sm:$0xff] }
 0xa85   :  { %v723_v26 = vsel %vm216_vm9, %v1361_v24, 0.0 }
 0xa86   :  { %1362 = vpow2.f32 %v721_v25  ;;  %724 = vadd.xlane.f32.xlu1 %v723_v26 }
 0xa89   :  { %v825_v27 = vpop.xlane.xlu0 %824 }
 0xa8a   :  { %v829_v28 = vsub.f32 %v796_v13, %v825_v27 }
 0xa8c   :  { %v1363_v29 = vpop.eup %1362  ;;  %v831_v30 = vmul.f32 1.442695, %v829_v28 }
 0xa8d   :  { %v726_v31 = vsel %vm216_vm9, %v1363_v29, 0.0 }
 0xa8e   :  { %1364 = vpow2.f32 %v831_v30  ;;  %727 = vadd.xlane.f32.xlu0 %v726_v31 }
 0xa91   :  { %v828_v32 = vpop.xlane.xlu2 %827 }
 0xa92   :  { %v830_v33 = vsub.f32 %v819_v16, %v828_v32  ;;  %v905_v16 = vpack.c.bf16 %v1256_v15, %v1255_v14  ;;  %v1275_v14 = vld [vmem:[%s1908_s11 + $0x70] sm:$0xff]  ;;  %v1276_v15 = vld [vmem:[%s1908_s11 + $0x78] sm:$0xff] }
 0xa94   :  { %v1365_v34 = vpop.eup %1364  ;;  %v833_v35 = vmul.f32 1.442695, %v830_v33  ;;  %922 = vmatpush.bf16.msrb.mxu0 %v905_v16  ;;  %v1050_v16 = vpack.c.bf16 %v1276_v15, %v1275_v14  ;;  %v1134_v14 = vld [vmem:[%s1912_s15 + $0x8] sm:$0xff] }
 0xa95   :  { %v835_v36 = vsel %vm216_vm9, %v1365_v34, 0.0 }
 0xa96   :  { %1366 = vpow2.f32 %v833_v35  ;;  %836 = vadd.xlane.f32.xlu0 %v835_v36 }
 0xa99   :  { %v736_v37 = vpop.permute.xlu2 %735 }
 0xa9a   :  { %v741_v38 = vsel %vm246_vm10, %v736_v37, 0 }
 0xa9b   :  { %750 = vmatpush.bf16.msrb.mxu2 %v741_v38 }
 0xa9c   :  { %v1367_v39 = vpop.eup %1366 }
 0xa9d   :  { %v838_v40 = vsel %vm216_vm9, %v1367_v39, 0.0 }
 0xa9e   :  { %839 = vadd.xlane.f32.xlu0 %v838_v40 }
 0xa9f   :  { %756 = vrot.lane.b32.xlu1 %v1734_v59, %s1940_s0 }
 0xaa1   :  { %v869_v55 = vpop.permute.xlu2 %868 }
 0xaa2   :  { %v874_v53 = vsel %vm246_vm10, %v869_v55, 0 }
 0xab2   :  { %847 = vrot.lane.b32.xlu0 %v1728_v52, %s1941_s30 }
 0xaf9   :  { %v725_v41 = vpop.xlane.xlu1 %724 }
 0xafa   :  { %1368 = vrcp.f32 %v725_v41  ;;  %v1266_v41 = vld [vmem:[%s1906_s9 + $0x38] sm:$0xff] }
 0xb00   :  { %v1369_v42 = vpop.eup %1368 }
 0xb01   :  { %v731_v43 = vmul.f32 %v1369_v42, %v1361_v24  ;;  %v728_v44 = vpop.xlane.xlu0 %727 }
 0xb02   :  { %1370 = vrcp.f32 %v728_v44 }
 0xb03   :  { %v733_v45 = vpack.c.bf16 %v731_v43, %v731_v43 }
 0xb05   :  { %1249 = vmatmul.msk.bf16.vlgmr.msrb.gmra.mxu2 %vm216_vm9, %v733_v45  ;;  %v1263_v45 = vld [vmem:[%s1906_s9 + $0x20] sm:$0xff] }
 0xb08   :  { %v1371_v48 = vpop.eup %1370 }
 0xb09   :  { %v837_v47 = vpop.xlane.xlu0 %836  ;;  %v732_v49 = vmul.f32 %v1371_v48, %v1363_v29 }
 0xb0b   :  { %v734_v52 = vpack.c.bf16 %v732_v49, %v732_v49 }
 0xb11   :  { %v757_v50 = vpop.permute.xlu1 %756  ;;  %v840_v56 = vpop.xlane.xlu0 %839 }
 0xb12   :  { %v762_v51 = vsel %vm246_vm10, %v757_v50, 0  ;;  %1372 = vrcp.f32 %v840_v56 }
 0xb13   :  { %771 = vmatpush.bf16.msra.mxu3 %v762_v51  ;;  %1374 = vrcp.f32 %v837_v47  ;;  %v1264_v47 = vld [vmem:[%s1906_s9 + $0x28] sm:$0xff] }
 0xb14   :  { %v995_v48 = vpack.c.bf16 %v1264_v47, %v1263_v45 }
 0xb16   :  { %1250 = vmatmul.msk.bf16.vlgmr.msra.gmra.mxu3 %vm216_vm9, %v734_v52 }
 0xb17   :  { %883 = vmatpush.bf16.msrb.mxu3 %v874_v53 }
 0xb18   :  { %v1373_v57 = vpop.eup %1372 }
 0xb19   :  { %v1375_v58 = vpop.eup %1374  ;;  %v844_v59 = vmul.f32 %v1373_v57, %v1367_v39 }
 0xb1a   :  { %v843_v60 = vmul.f32 %v1375_v58, %v1365_v34 }
 0xb1b   :  { %v846_v61 = vpack.c.bf16 %v844_v59, %v844_v59 }
 0xb1c   :  { %v845_v0 = vpack.c.bf16 %v843_v60, %v843_v60 }
 0xb24   :  { %v848_v62 = vpop.permute.xlu0 %847 }
 0xb25   :  { %v853_v63 = vsel %vm246_vm10, %v848_v62, 0 }
 0xb26   :  { %862 = vmatpush.bf16.msra.mxu2 %v853_v63  ;;  %1254 = vmatmul.msk.bf16.vlgmr.msrb.gmra.mxu3 %vm216_vm9, %v846_v61 }
 0xb29   :  { %1253 = vmatmul.msk.bf16.vlgmr.msra.gmra.mxu2 %vm216_vm9, %v845_v0 }
 0xb2a   :  { %1063 = vmatpush.bf16.msrb.mxu2 %v1050_v16 }
 0xb88   :  { %v752_v1 = vpop.f32.mrf.mxu2 }
 0xb90   :  { %v754_v2 = vpop.f32.mrf.mxu2 }
 0xb91   :  { %v1317_v2 = vld [vmem:[%s1904_s7 + $0x1] ss:$0 sm:$0xff] }
 0xb99   :  { %v773_v6 = vpop.f32.mrf.mxu3 }
 0xba1   :  { %v775_v7 = vpop.f32.mrf.mxu3 }
 0xba9   :  { %v885_v8 = vpop.f32.mrf.mxu3 }
 0xbac   :  { %v864_v9 = vpop.f32.mrf.mxu2 }
 0xbad   :  { %v1300_v10 = vpack.i.bf16 %v885_v8, %v864_v9 }
 0xbaf   :  { %1301 = vrot.lane.b32.xlu1 %v1300_v10, %s1942_s27 }
 0xbb1   :  { %v887_v12 = vpop.f32.mrf.mxu3 }
 0xbb4   :  { %v866_v13 = vpop.f32.mrf.mxu2 }
 0xc21   :  { %v1302_v17 = vpop.permute.xlu1 %1301 }
 0xc22   :  { %v1304_v18 = vunpack.i.h.bf16 %v1302_v17  ;;  %v1303_v19 = vunpack.i.l.bf16 %v1302_v17  ;;  %v1273_v17 = vld [vmem:[%s1908_s11 + $0x60] sm:$0xff] }
 0xc24   :  { %v898_v20 = vsel %vm172_vm8, %v773_v6, %v1304_v18  ;;  %v897_v21 = vsel %vm172_vm8, %v752_v1, %v1303_v19  ;;  %v1318_v6 = vld [vmem:[%s1905_s8 + $0x1] ss:$0 sm:$0xff]  ;;  %v1274_v18 = vld [vmem:[%s1908_s11 + $0x68] sm:$0xff] }
 0xc25   :  { %v904_v22 = vpack.c.bf16 %v898_v20, %v897_v21  ;;  %v1049_v19 = vpack.c.bf16 %v1274_v18, %v1273_v17  ;;  %v1271_v20 = vld [vmem:[%s1908_s11 + $0x50] sm:$0xff]  ;;  %v1272_v21 = vld [vmem:[%s1908_s11 + $0x58] sm:$0xff] }
 0xc27   :  { %1260 = vmatmul.msk.bf16.vlgmr.msrb.gmra.mxu0 %vm75_vm0, %v904_v22  ;;  %1064 = vmatpush.bf16.msrb.mxu2 %v1049_v19  ;;  %v1048_v22 = vpack.c.bf16 %v1272_v21, %v1271_v20 }
 0xc2b   :  { %1065 = vmatpush.bf16.msrb.mxu2 %v1048_v22 }
 0xca4   :  { %v924_v24 = vpop.f32.mrf.mxu0 }
 0xca5   :  { %v925_v25 = vadd.f32 %v1316_v23, %v924_v24  ;;  %v1269_v24 = vld [vmem:[%s1908_s11 + $0x40] sm:$0xff] }
 0xca7   :  { %v929_v26 = vadd.f32 %v925_v25, %v1718_v54  ;;  %v1270_v25 = vld [vmem:[%s1908_s11 + $0x48] sm:$0xff] }
 0xca9   :  { %v935_v27 = vsel %vm75_vm0, %v929_v26, 0.0 }
 0xcaa   :  { %936 = vadd.xlane.f32.xlu2 %v935_v27 }
 0xcac   :  { %v926_v28 = vpop.f32.mrf.mxu0 }
 0xcad   :  { %v927_v29 = vadd.f32 %v1316_v23, %v926_v28  ;;  %v1319_v23 = vld [vmem:[%s1907_s10 + $0x1] ss:$0 sm:$0xff] }
 0xcaf   :  { %v930_v30 = vadd.f32 %v927_v29, %v1720_v46  ;;  %v1265_v46 = vld [vmem:[%s1906_s9 + $0x30] sm:$0xff]  ;;  %s1414_s9 = smov [#allocation3]  }
 0xcb0   :  { %v996_v42 = vpack.c.bf16 %v1266_v41, %v1265_v46 }
 0xcb1   :  { %v938_v31 = vsel %vm75_vm0, %v930_v30, 0.0 }
 0xcb2   :  { %939 = vadd.xlane.f32.xlu1 %v938_v31  ;;  %1011 = vmatpush.bf16.msrb.mxu1 %v996_v42 }
 0xcb6   :  { %1012 = vmatpush.bf16.msrb.mxu1 %v995_v48 }
 0xd1d   :  { %v937_v32 = vpop.xlane.xlu2 %936 }
 0xd1e   :  { %v941_v33 = vmul.f32 %v937_v32, %v1536_v11 }
 0xd20   :  { %v943_v34 = vsub.f32 %v929_v26, %v941_v33  ;;  %v1047_v26 = vpack.c.bf16 %v1270_v25, %v1269_v24 }
 0xd22   :  { %v945_v35 = vmul.f32 %v943_v34, %v943_v34  ;;  %1066 = vmatpush.bf16.msrb.mxu2 %v1047_v26 }
 0xd24   :  { %v947_v36 = vsel %vm75_vm0, %v945_v35, 0.0 }
 0xd25   :  { %v940_v37 = vpop.xlane.xlu1 %939  ;;  %948 = vadd.xlane.f32.xlu0 %v947_v36 }
 0xd26   :  { %v942_v54 = vmul.f32 %v940_v37, %v1536_v11 }
 0xd28   :  { %v944_v38 = vsub.f32 %v930_v30, %v942_v54 }
 0xd2a   :  { %v946_v39 = vmul.f32 %v944_v38, %v944_v38 }
 0xd2c   :  { %v950_v40 = vsel %vm75_vm0, %v946_v39, 0.0 }
 0xd2d   :  { %951 = vadd.xlane.f32.xlu2 %v950_v40 }
 0xd98   :  { %v949_v43 = vpop.xlane.xlu0 %948 }
 0xd99   :  { %v953_v44 = vmul.f32 %v949_v43, %v1536_v11 }
 0xd9b   :  { %v955_v55 = vadd.f32 1e-12, %v953_v44 }
 0xd9d   :  { %1376 = vrsqrt.f32 %v955_v55  ;;  %vm963_vm9 = vweird.f32 %v955_v55 }
 0xda0   :  { %v952_v49 = vpop.xlane.xlu2 %951 }
 0xda1   :  { %v954_v50 = vmul.f32 %v952_v49, %v1536_v11 }
 0xda3   :  { %v1377_v51 = vpop.eup %1376  ;;  %v956_v53 = vadd.f32 1e-12, %v954_v50 }
 0xda4   :  { %v958_v52 = vmul.f32 %v1377_v51, %v955_v55  ;;  %vm964_vm8 = vweird.f32 %v1377_v51  ;;  %v1320_v55 = vld [vmem:[%s1909_s12 + $0x1] ss:$0 sm:$0xff] }
 0xda5   :  { %1378 = vrsqrt.f32 %v956_v53  ;;  %vm965_vm10 = vmor %vm963_vm9, %vm964_vm8  ;;  %vm973_vm13 = vweird.f32 %v956_v53 }
 0xda6   :  { %v959_v56 = vmul.f32 %v1377_v51, %v958_v52 }
 0xda8   :  { %v960_v57 = vmul.f32 0.5, %v959_v56 }
 0xdaa   :  { %v961_v58 = vsub.f32 1.5, %v960_v57 }
 0xdab   :  { %v1379_v59 = vpop.eup %1378 }
 0xdac   :  { %v962_v60 = vmul.f32 %v1377_v51, %v961_v58  ;;  %v968_v61 = vmul.f32 %v1379_v59, %v956_v53  ;;  %vm974_vm12 = vweird.f32 %v1379_v59 }
 0xdad   :  { %vm975_vm14 = vmor %vm973_vm13, %vm974_vm12 }
 0xdae   :  { %v969_v62 = vmul.f32 %v1379_v59, %v968_v61  ;;  %v966_v63 = vsel %vm965_vm10, %v1377_v51, %v962_v60 }
 0xdaf   :  { %v977_v3 = vmul.f32 %v966_v63, %v943_v34 }
 0xdb0   :  { %v970_v0 = vmul.f32 0.5, %v969_v62 }
 0xdb1   :  { %v982_v7 = vmul.f32 %v1317_v2, %v977_v3 }
 0xdb2   :  { %v971_v1 = vsub.f32 1.5, %v970_v0 }
 0xdb3   :  { %v987_v10 = vadd.f32 %v1318_v6, %v982_v7 }
 0xdb4   :  { %v972_v4 = vmul.f32 %v1379_v59, %v971_v1 }
 0xdb6   :  { %v976_v5 = vsel %vm975_vm14, %v1379_v59, %v972_v4 }
 0xdb7   :  { %v978_v8 = vmul.f32 %v976_v5, %v944_v38 }
 0xdb9   :  { %v983_v9 = vmul.f32 %v1317_v2, %v978_v8  ;;  %v1135_v8 = vld [vmem:[%s1912_s15 + $0x10] sm:$0xff] }
 0xdbb   :  { %v988_v12 = vadd.f32 %v1318_v6, %v983_v9  ;;  %v1136_v9 = vld [vmem:[%s1912_s15 + $0x18] sm:$0xff] }
 0xdbd   :  { %v994_v13 = vpack.c.bf16 %v988_v12, %v987_v10 }
 0xdbf   :  { %1268 = vmatmul.msk.bf16.vlgmr.msrb.gmra.mxu1 %vm75_vm0, %v994_v13  ;;  %v1133_v13 = vld [vmem:[%s1912_s15] sm:$0xff] }
 0xdc0   :  { %v1139_v16 = vpack.c.bf16 %v1134_v14, %v1133_v13 }
 0xe3c   :  { %v1014_v27 = vpop.f32.mrf.mxu1 }
 0xe3d   :  { %v1015_v28 = vadd.f32 %v1319_v23, %v1014_v27 }
 0xe3f   :  { %v1019_v29 = vmul.f32 %v1015_v28, %v1015_v28 }
 0xe41   :  { %v1021_v30 = vmul.f32 %v1019_v29, %v1015_v28 }
 0xe43   :  { %v1023_v31 = vmul.f32 0.044715, %v1021_v30 }
 0xe44   :  { %v1016_v32 = vpop.f32.mrf.mxu1 }
 0xe45   :  { %v1025_v33 = vadd.f32 %v1023_v31, %v1015_v28  ;;  %v1017_v34 = vadd.f32 %v1319_v23, %v1016_v32  ;;  %v1322_v32 = vld [vmem:[%s1911_s14 + $0x1] ss:$0 sm:$0xff] }
 0xe47   :  { %v1027_v35 = vmul.f32 0.7978846, %v1025_v33  ;;  %v1020_v36 = vmul.f32 %v1017_v34, %v1017_v34 }
 0xe49   :  { %v1022_v37 = vmul.f32 %v1020_v36, %v1017_v34  ;;  %1380 = vtanh.f32 %v1027_v35 }
 0xe4b   :  { %v1024_v54 = vmul.f32 0.044715, %v1022_v37 }
 0xe4d   :  { %v1026_v38 = vadd.f32 %v1024_v54, %v1017_v34 }
 0xe4f   :  { %v1028_v39 = vmul.f32 0.7978846, %v1026_v38  ;;  %v1381_v40 = vpop.eup %1380 }
 0xe50   :  { %v1031_v46 = vadd.f32 1.0, %v1381_v40 }
 0xe51   :  { %1382 = vtanh.f32 %v1028_v39 }
 0xe52   :  { %v1033_v42 = vmul.f32 0.5, %v1031_v46 }
 0xe54   :  { %v1035_v45 = vmul.f32 %v1033_v42, %v1015_v28 }
 0xe57   :  { %v1383_v41 = vpop.eup %1382 }
 0xe58   :  { %v1032_v43 = vadd.f32 1.0, %v1383_v41 }
 0xe5a   :  { %v1034_v44 = vmul.f32 0.5, %v1032_v43 }
 0xe5c   :  { %v1036_v47 = vmul.f32 %v1034_v44, %v1017_v34  ;;  %v1323_v44 = vld [vmem:[%s1913_s16] ss:$0 sm:$0xff] }
 0xe5e   :  { %v1046_v48 = vpack.c.bf16 %v1036_v47, %v1035_v45 }
 0xe60   :  { %1278 = vmatmul.msk.bf16.vlgmr.msrb.gmra.mxu2 %vm555_vm2, %v1046_v48  ;;  %v1324_v48 = vld [vmem:[%s1914_s17] ss:$0 sm:$0xff] }
 0xee3   :  { %v1068_v49 = vpop.f32.mrf.mxu2 }
 0xee4   :  { %v1069_v50 = vadd.f32 %v1320_v55, %v1068_v49 }
 0xee6   :  { %v1073_v51 = vadd.f32 %v1069_v50, %v987_v10  ;;  %v1140_v10 = vpack.c.bf16 %v1136_v9, %v1135_v8 }
 0xee8   :  { %v1079_v53 = vsel %vm75_vm0, %v1073_v51, 0.0  ;;  %1162 = vmatpush.bf16.msra.mxu3 %v1140_v10 }
 0xee9   :  { %1080 = vadd.xlane.f32.xlu2 %v1079_v53  ;;  %v1325_v53 = vld [vmem:[#allocation2] ss:$0 sm:$0xff] }
 0xeeb   :  { %v1070_v52 = vpop.f32.mrf.mxu2 }
 0xeec   :  { %v1071_v56 = vadd.f32 %v1320_v55, %v1070_v52  ;;  %1163 = vmatpush.bf16.msra.mxu3 %v1139_v16  ;;  %v1186_v52 = vld [vmem:[%s1916_s19] sm:$0x3] }
 0xeee   :  { %v1074_v57 = vadd.f32 %v1071_v56, %v988_v12 }
 0xef0   :  { %v1082_v58 = vsel %vm75_vm0, %v1074_v57, 0.0 }
 0xef1   :  { %1083 = vadd.xlane.f32.xlu1 %v1082_v58 }
 0xf5c   :  { %v1081_v59 = vpop.xlane.xlu2 %1080 }
 0xf5d   :  { %v1085_v60 = vmul.f32 %v1081_v59, %v1536_v11 }
 0xf5f   :  { %v1087_v61 = vsub.f32 %v1073_v51, %v1085_v60 }
 0xf61   :  { %v1089_v62 = vmul.f32 %v1087_v61, %v1087_v61 }
 0xf63   :  { %v1091_v63 = vsel %vm75_vm0, %v1089_v62, 0.0 }
 0xf64   :  { %v1084_v0 = vpop.xlane.xlu1 %1083  ;;  %1092 = vadd.xlane.f32.xlu1 %v1091_v63 }
 0xf65   :  { %v1086_v1 = vmul.f32 %v1084_v0, %v1536_v11 }
 0xf67   :  { %v1088_v2 = vsub.f32 %v1074_v57, %v1086_v1 }
 0xf69   :  { %v1090_v3 = vmul.f32 %v1088_v2, %v1088_v2 }
 0xf6b   :  { %v1094_v4 = vsel %vm75_vm0, %v1090_v3, 0.0 }
 0xf6c   :  { %1095 = vadd.xlane.f32.xlu0 %v1094_v4 }
 0xfd7   :  { %v1093_v5 = vpop.xlane.xlu1 %1092 }
 0xfd8   :  { %v1097_v6 = vmul.f32 %v1093_v5, %v1536_v11 }
 0xfda   :  { %v1099_v7 = vadd.f32 1e-12, %v1097_v6 }
 0xfdc   :  { %1384 = vrsqrt.f32 %v1099_v7  ;;  %vm1107_vm1 = vweird.f32 %v1099_v7 }
 0xfdf   :  { %v1096_v12 = vpop.xlane.xlu0 %1095 }
 0xfe0   :  { %v1098_v15 = vmul.f32 %v1096_v12, %v1536_v11  ;;  %v1321_v11 = vld [vmem:[%s1910_s13 + $0x1] ss:$0 sm:$0xff] }
 0xfe2   :  { %v1385_v17 = vpop.eup %1384  ;;  %v1100_v18 = vadd.f32 1e-12, %v1098_v15 }
 0xfe3   :  { %v1102_v19 = vmul.f32 %v1385_v17, %v1099_v7  ;;  %vm1108_vm15 = vweird.f32 %v1385_v17 }
 0xfe4   :  { %1386 = vrsqrt.f32 %v1100_v18  ;;  %vm1109_vm2 = vmor %vm1107_vm1, %vm1108_vm15  ;;  %vm1117_vm4 = vweird.f32 %v1100_v18 }
 0xfe5   :  { %v1103_v20 = vmul.f32 %v1385_v17, %v1102_v19 }
 0xfe7   :  { %v1104_v21 = vmul.f32 0.5, %v1103_v20 }
 0xfe9   :  { %v1105_v22 = vsub.f32 1.5, %v1104_v21 }
 0xfea   :  { %v1387_v23 = vpop.eup %1386 }
 0xfeb   :  { %v1106_v24 = vmul.f32 %v1385_v17, %v1105_v22  ;;  %v1112_v25 = vmul.f32 %v1387_v23, %v1100_v18  ;;  %vm1118_vm3 = vweird.f32 %v1387_v23 }
 0xfec   :  { %vm1119_vm5 = vmor %vm1117_vm4, %vm1118_vm3 }
 0xfed   :  { %v1110_v26 = vsel %vm1109_vm2, %v1385_v17, %v1106_v24  ;;  %v1113_v27 = vmul.f32 %v1387_v23, %v1112_v25 }
 0xfee   :  { %v1121_v29 = vmul.f32 %v1110_v26, %v1087_v61  ;;  %v1413_v61 = vmov 2.0  }
 0xfef   :  { %v1114_v28 = vmul.f32 0.5, %v1113_v27 }
 0xff0   :  { %v1126_v33 = vmul.f32 %v1321_v11, %v1121_v29 }
 0xff1   :  { %v1115_v30 = vsub.f32 1.5, %v1114_v28 }
 0xff2   :  { %v1131_v36 = vadd.f32 %v1322_v32, %v1126_v33 }
 0xff3   :  { %v1116_v31 = vmul.f32 %v1387_v23, %v1115_v30 }
 0xff4   :  { %v1137_v38 = vpack.c.bf16 %v1131_v36, %v1131_v36 }
 0xff5   :  { %v1120_v34 = vsel %vm1119_vm5, %v1387_v23, %v1116_v31 }
 0xff6   :  { %v1122_v35 = vmul.f32 %v1120_v34, %v1088_v2  ;;  %v1147_v46 = vunpack.c.l.b16 %v1137_v38 }
 0xff8   :  { %v1127_v37 = vmul.f32 %v1321_v11, %v1122_v35 }
 0xffa   :  { %v1132_v54 = vadd.f32 %v1322_v32, %v1127_v37 }
 0xffc   :  { %v1138_v39 = vpack.c.bf16 %v1132_v54, %v1132_v54 }
 0xffe   :  { %v1148_v40 = vunpack.c.l.b16 %v1138_v39 }
0x1000   :  { %v1149_v41 = vrot.slane %v1148_v40, 7 }
0x1002   :  { %v1151_v42 = vsel %vm1150_vm6, %v1149_v41, %v1147_v46 }
0x1003   :  { %v1152_v43 = vpack.c.b16 %v1151_v42, %v1151_v42 }
0x1005   :  { %1281 = vmatmul.msk.bf16.vlgmr.msra.gmra.mxu3 %vm75_vm0, %v1152_v43  ;;  %vm1184_vm0 = vcmask 1024  }
0x1088   :  { %v1165_v45 = vpop.f32.mrf.mxu3 }
0x1089   :  { %v1166_v47 = vadd.f32 %v1323_v44, %v1165_v45 }
0x108b   :  { %1388 = vtanh.f32 %v1166_v47 }
0x108c   :  { %1390 = vrcp.f32 %v1413_v61 }
0x1090   :  { %v1167_v55 = vpop.f32.mrf.mxu3 }
0x1091   :  { %v1389_v49 = vpop.eup %1388 }
0x1092   :  { %v1174_v50 = vmul.f32 %v1389_v49, %v1324_v48  ;;  %v1391_v62 = vpop.eup %1390 }
0x1093   :  { %v1200_v63 = vmul.f32 2.0, %v1391_v62  ;;  %vm1204_vm11 = vweird.f32 %v1391_v62 }
0x1094   :  { %v1176_v51 = vsel %vm1175_vm7, %v1174_v50, 0.0 }
0x1095   :  { %1177 = vadd.xlane.f32.xlu2 %v1176_v51  ;;  %v1201_v0 = vsub.f32 1.0, %v1200_v63 }
0x1097   :  { %v1202_v4 = vmul.f32 %v1391_v62, %v1201_v0 }
0x1099   :  { %v1203_v7 = vadd.f32 %v1391_v62, %v1202_v4 }
0x109b   :  { %v1205_v10 = vsel %vm1204_vm11, %v1391_v62, %v1203_v7 }
0x1108   :  { %v1178_v56 = vpop.xlane.xlu2 %1177 }
0x1109   :  { %v1183_v57 = vadd.f32 %v1325_v53, %v1178_v56 }
0x110b   :  { %v1187_v58 = vsub.f32 %v1183_v57, %v1186_v52  ;;  %1185 = vst.msk [vmem:[%s1917_s20] sm:$0x3] %vm1184_vm0, %v1183_v57  ;;  %s1217_s20 = sshll.u32 %s1918_s21, 4  ;;  %s1218_s20 = int_to_ptr.hbm [resolvable:$true] %s1217_s20 }
0x110d   :  { %v1188_v59 = vmul.f32 %v1187_v58, %v1187_v58 }
0x110f   :  { %v1189_v60 = vsel %vm1184_vm0, %v1188_v59, 0.0 }
0x1110   :  { %1190 = vadd.xlane.f32.xlu0 %v1189_v60 }
0x1183   :  { %v1191_v1 = vpop.xlane.xlu0 %1190 }
0x1184   :  { %v1192_v2 = vrot.slane %v1191_v1, 4 }
0x1186   :  { %v1193_v3 = vadd.f32 %v1192_v2, %v1191_v1 }
0x1188   :  { %v1194_v5 = vrot.slane %v1193_v3, 2 }
0x118a   :  { %v1195_v6 = vadd.f32 %v1194_v5, %v1193_v3 }
0x118c   :  { %v1196_v8 = vrot.slane %v1195_v6, 1 }
0x118e   :  { %v1197_v9 = vadd.f32 %v1196_v8, %v1195_v6 }
0x1190   :  { %1282 = vpush %v1197_v9 }
0x1191   :  { %1284 = vpush %v1205_v10 }
0x11c1   :  { %s1283_s30 = spop %1282 }
0x11c2   :  { %s1285_s5 = spop %1284 }
0x11c3   :  { %s1207_s22 = smul.f32 %s1285_s5, %s1283_s30 }
0x11c5   :  { %1209 = sst [smem:[#allocation3]] %s1207_s22 }
0x11c6   :  { %1220 = dma.smem_to_hbm %s1414_s9, 16, %s1218_s20, [#allocation4]  }
0x11c7   :  { %1404 = dma.done.wait [#allocation4], 16  }
0x11c8   :  { %1405 = vsyncadd [#allocation4], 4294967280 }
0x11c9   :  { %1227 = sfence }
0x11ca   :  { %1228 = vsyncpa [#allocation4], 1 }

</bundles_post_ra>
